<compile_context>
chip_gen: v6e
topology: v6e:2x2x1
jax: 0.10.0
libtpu: 0.0.40
codegen_flags: <defaults>
</compile_context>

<pallas_src>
import math

import jax
import jax.numpy as jnp
import numpy as np
from jax import lax
from jax.experimental import pallas as pl
from jax.experimental.pallas import tpu as pltpu

# ----------------------- small synthetic configuration -----------------------
B = 2                # batch
S = 8                # sequence length (module's MAX_SEQ_LEN=128; small here)
BS = B * S
V = 100              # vocab size
V_PAD = 128          # vocab padded to one full lane tile
H = 32               # base_model_hidden_size
NH = 2               # attention heads
DH = H // NH         # head dim
HP = 128             # per-head padded lane width (head weights live in lanes [0, DH))
FF = 4 * H           # transformer FFN inner dim
R = 4                # LoRA rank
LORA_ALPHA = 8.0     # LoRA alpha (scale = alpha / r)
M1, M2 = 128, 64     # mlp_hidden_1, mlp_hidden_2
C = 5                # num_classes
EPS = 1e-5
OUT_PAD = 128        # lane-dense logits width (first C lanes are real)
OUT_ROWS = 8         # sublane-dense output rows (first B rows are real)
NEG = -1e9
SLAB_W = 128         # lane width of both packed slabs


# ----------------------- packed-slab layouts (static, Python-side) -----------
def _build_const_layout():
    layout = {}
    off = 0

    def add(name, rows):
        nonlocal off
        layout[name] = (off, rows)
        off += rows

    for h in range(NH):
        add(f"wq_h{h}", H)
    for h in range(NH):
        add(f"wk_h{h}", H)
    for h in range(NH):
        add(f"wv_h{h}", H)
    for h in range(NH):
        add(f"wo_h{h}", HP)
    add("wf1", H)
    add("wf2", FF)
    add("w1", H)
    add("w2", M1)
    add("w3", M2)
    add("sel", OUT_ROWS)
    for h in range(NH):
        add(f"bq_h{h}", 1)
    for h in range(NH):
        add(f"bk_h{h}", 1)
    for h in range(NH):
        add(f"bv_h{h}", 1)
    for name in ["bo", "ln1_g", "ln1_b", "bf1", "bf2",
                 "ln2_g", "ln2_b", "b1", "b2", "b3"]:
        add(name, 1)
    total = ((off + 7) // 8) * 8
    return layout, total


CONST_LAYOUT, CONST_ROWS = _build_const_layout()

# runtime slab rows
RT_ONEHOT = 0                 # rows [0, BS): one-hot token ids (BS, V_PAD)
RT_POS = BS                   # rows [BS, 2*BS): pre-tiled positional emb (BS, H)
RT_MASK = 2 * BS              # rows [2*BS, 2*BS+B): additive attention bias (B, S)
RT_ROWS = ((2 * BS + B + 7) // 8) * 8


# ----------------------- Pallas kernel ---------------------------------------
def peft_mlp_kernel(const_ref, rt_ref, emb_ref, out_ref):
    def cblk(name, cols=SLAB_W):
        r0, nr = CONST_LAYOUT[name]
        return const_ref[r0:r0 + nr, :cols]

    # ---- runtime inputs (single small slab) ----
    onehot = rt_ref[RT_ONEHOT:RT_ONEHOT + BS, :]                 # (BS, 128)
    pos = rt_ref[RT_POS:RT_POS + BS, :H]                         # (BS, H)
    attn_bias = rt_ref[RT_MASK:RT_MASK + B, :S][:, None, :]      # (B, 1, S)

    # ---- embedding lookup (wrapper-built one-hot, 128-aligned contraction) ----
    x = jnp.dot(onehot, emb_ref[...], preferred_element_type=jnp.float32) + pos  # (BS, H)

    inv_sqrt = 1.0 / math.sqrt(DH)

    # ---- attention: per-head weight blocks, no lane-offset slices / concats ----
    attn = None
    for h in range(NH):
        # head weights live in lanes [0, DH) of a 128-wide block; padded lanes 0.
        q = jnp.dot(x, cblk(f"wq_h{h}"), preferred_element_type=jnp.float32) + cblk(f"bq_h{h}")
        k = jnp.dot(x, cblk(f"wk_h{h}"), preferred_element_type=jnp.float32) + cblk(f"bk_h{h}")
        v = jnp.dot(x, cblk(f"wv_h{h}"), preferred_element_type=jnp.float32) + cblk(f"bv_h{h}")
        q3 = q.reshape(B, S, HP)
        k3 = k.reshape(B, S, HP)
        v3 = v.reshape(B, S, HP)

        s = jnp.einsum("bqd,bkd->bqk", q3, k3,
                       preferred_element_type=jnp.float32) * inv_sqrt + attn_bias
        m = jnp.max(s, axis=-1, keepdims=True)
        p = jnp.exp(s - m)
        denom = jnp.maximum(jnp.sum(p, axis=-1, keepdims=True), 1e-6)  # guard
        probs = p * pl.reciprocal(denom, approx=True)                  # EUP slot
        ctx = jnp.einsum("bqk,bkd->bqd", probs, v3,
                         preferred_element_type=jnp.float32)           # (B,S,HP)

        # per-head W_o block (zero-padded rows) -> accumulate; replaces concat+W_o.
        part = jnp.dot(ctx.reshape(BS, HP), cblk(f"wo_h{h}", cols=H),
                       preferred_element_type=jnp.float32)             # (BS, H)
        attn = part if attn is None else attn + part
    attn = attn + cblk("bo", cols=H)

    def layernorm(t, g, b):                      # t:(BS,H)  g,b:(1,H)
        mu = jnp.mean(t, axis=-1, keepdims=True)
        var = jnp.mean((t - mu) ** 2, axis=-1, keepdims=True)
        return (t - mu) * lax.rsqrt(var + EPS) * g + b

    h1 = layernorm(x + attn, cblk("ln1_g", cols=H), cblk("ln1_b", cols=H))

    # ---- transformer FFN (GELU, tanh approximation) ----
    f = jnp.dot(h1, cblk("wf1"), preferred_element_type=jnp.float32) + cblk("bf1")
    f = 0.5 * f * (1.0 + jnp.tanh(0.7978845608028654 * (f + 0.044715 * f * f * f)))
    f = jnp.dot(f, cblk("wf2", cols=H), preferred_element_type=jnp.float32) + cblk("bf2", cols=H)
    h2 = layernorm(h1 + f, cblk("ln2_g", cols=H), cblk("ln2_b", cols=H))  # last_hidden_state

    # ---- MLP head on ALL rows; CLS selection deferred to the final store ----
    z = jnp.maximum(jnp.dot(h2, cblk("w1"),
                            preferred_element_type=jnp.float32) + cblk("b1"), 0.0)
    # Dropout(p=0.5) is identity in inference/eval mode.
    z = jnp.maximum(jnp.dot(z, cblk("w2", cols=M2),
                            preferred_element_type=jnp.float32) + cblk("b2", cols=M2), 0.0)
    # Dropout(p=0.3) is identity in inference/eval mode.
    logits = jnp.dot(z, cblk("w3"),
                     preferred_element_type=jnp.float32) + cblk("b3")   # (BS, 128)

    # CLS-row selection as a tiny MXU matmul (no XLU sublane gather);
    # rows B..OUT_ROWS-1 of the (8,128) output tile are zero padding.
    out_ref[...] = jnp.dot(cblk("sel", cols=BS), logits,
                           preferred_element_type=jnp.float32)          # (8, 128)


# ----------------------- wrapper (glue) ---------------------------------------
def _pack_const_slab(p):
    lscale = LORA_ALPHA / R
    # Merge LoRA adapters into the base weights (inference-only, exact math).
    wq_eff = p["wq"] + lscale * (p["lora_a_q"] @ p["lora_b_q"])
    wv_eff = p["wv"] + lscale * (p["lora_a_v"] @ p["lora_b_v"])

    blocks = {}
    for h in range(NH):
        sl = slice(h * DH, (h + 1) * DH)
        blocks[f"wq_h{h}"] = wq_eff[:, sl]            # (H, DH) -> padded to (H,128)
        blocks[f"wk_h{h}"] = p["wk"][:, sl]
        blocks[f"wv_h{h}"] = wv_eff[:, sl]
        blocks[f"wo_h{h}"] = p["wo"][sl, :]           # (DH, H) -> padded to (128,128)
        blocks[f"bq_h{h}"] = p["bq"][sl][None, :]
        blocks[f"bk_h{h}"] = p["bk"][sl][None, :]
        blocks[f"bv_h{h}"] = p["bv"][sl][None, :]
    blocks["wf1"] = p["wf1"]
    blocks["wf2"] = p["wf2"]
    blocks["w1"] = p["w1"]
    blocks["w2"] = p["w2"]
    blocks["w3"] = jnp.pad(p["w3"], ((0, 0), (0, OUT_PAD - C)))  # lane-dense logits

    sel = jnp.zeros((OUT_ROWS, BS), jnp.float32)
    for b in range(B):
        sel = sel.at[b, b * S].set(1.0)               # pick CLS row of each sample
    blocks["sel"] = sel

    for nm in ["bo", "ln1_g", "ln1_b", "bf1", "bf2", "ln2_g", "ln2_b",
               "b1", "b2", "b3"]:
        blocks[nm] = p[nm][None, :]

    slab = jnp.zeros((CONST_ROWS, SLAB_W), jnp.float32)
    for name, arr in blocks.items():
        r0, nr = CONST_LAYOUT[name]
        arr = jnp.asarray(arr, jnp.float32)
        arr = jnp.pad(arr, ((0, nr - arr.shape[0]), (0, SLAB_W - arr.shape[1])))
        slab = slab.at[r0:r0 + nr, :].set(arr)
    return slab


def _pack_runtime_slab(input_ids, attention_mask, pos_emb):
    # clamp ids like the reference gather would; build one-hot over padded vocab.
    ids = jnp.clip(input_ids.astype(jnp.int32), 0, V - 1)
    onehot = jax.nn.one_hot(ids, V_PAD, dtype=jnp.float32).reshape(BS, V_PAD)
    pos_tiled = jnp.tile(pos_emb.astype(jnp.float32), (B, 1))          # (BS, H)
    mask_bias = (1.0 - attention_mask.astype(jnp.float32)) * NEG       # (B, S)

    slab = jnp.zeros((RT_ROWS, SLAB_W), jnp.float32)
    slab = slab.at[RT_ONEHOT:RT_ONEHOT + BS, :V_PAD].set(onehot)
    slab = slab.at[RT_POS:RT_POS + BS, :H].set(pos_tiled)
    slab = slab.at[RT_MASK:RT_MASK + B, :S].set(mask_bias)
    return slab


def peft_mlp_forward(input_ids, attention_mask, emb_table, pos_emb, p):
    const_slab = _pack_const_slab(p)                          # (856, 128) f32
    rt_slab = _pack_runtime_slab(input_ids, attention_mask, pos_emb)
    emb_pad = jnp.pad(emb_table.astype(jnp.float32),
                      ((0, V_PAD - V), (0, 0)))               # (128, H)

    out = pl.pallas_call(
        peft_mlp_kernel,
        out_shape=jax.ShapeDtypeStruct((OUT_ROWS, OUT_PAD), jnp.float32),
        in_specs=[pl.BlockSpec(memory_space=pltpu.MemorySpace.VMEM)] * 3,
        out_specs=pl.BlockSpec(memory_space=pltpu.MemorySpace.VMEM),
    )(const_slab, rt_slab, emb_pad)
    return out[:B, :C]


# ----------------------- pure-JAX reference (module math, unmerged LoRA) -----
def reference_forward(input_ids, attention_mask, emb_table, pos_emb, d):
    lscale = LORA_ALPHA / R
    x = emb_table[input_ids] + pos_emb[None]                      # (B,S,H)

    def dense(t, w, b):
        return jnp.einsum("bsi,io->bso", t, w) + b

    def lora(t, a, bm):
        return jnp.einsum("bsr,ro->bso", jnp.einsum("bsi,ir->bsr", t, a), bm)

    q = dense(x, d["wq"], d["bq"]) + lscale * lora(x, d["lora_a_q"], d["lora_b_q"])
    k = dense(x, d["wk"], d["bk"])
    v = dense(x, d["wv"], d["bv"]) + lscale * lora(x, d["lora_a_v"], d["lora_b_v"])

    bias = ((1.0 - attention_mask) * NEG)[:, None, :]
    inv_sqrt = 1.0 / math.sqrt(DH)
    ctx_heads = []
    for h in range(NH):
        sl = slice(h * DH, (h + 1) * DH)
        s = jnp.einsum("bqd,bkd->bqk", q[:, :, sl], k[:, :, sl]) * inv_sqrt + bias
        probs = jax.nn.softmax(s, axis=-1)
        ctx_heads.append(jnp.einsum("bqk,bkd->bqd", probs, v[:, :, sl]))
    ctx = jnp.concatenate(ctx_heads, axis=-1)
    attn = jnp.einsum("bsi,io->bso", ctx, d["wo"]) + d["bo"]

    def ln(t, g, b):
        mu = jnp.mean(t, -1, keepdims=True)
        var = jnp.mean((t - mu) ** 2, -1, keepdims=True)
        return (t - mu) * lax.rsqrt(var + EPS) * g + b

    h1 = ln(x + attn, d["ln1_g"], d["ln1_b"])
    f = jnp.einsum("bsi,io->bso", h1, d["wf1"]) + d["bf1"]
    f = 0.5 * f * (1.0 + jnp.tanh(0.7978845608028654 * (f + 0.044715 * f ** 3)))
    f = jnp.einsum("bsi,io->bso", f, d["wf2"]) + d["bf2"]
    h2 = ln(h1 + f, d["ln2_g"], d["ln2_b"])

    cls = h2[:, 0, :]
    z = jnp.maximum(cls @ d["w1"] + d["b1"], 0.0)
    z = jnp.maximum(z @ d["w2"] + d["b2"], 0.0)
    return z @ d["w3"] + d["b3"]


# ----------------------- deterministic parameter init ------------------------
def init_params(key):
    shapes = {
        "wq": (H, H), "bq": (H,), "lora_a_q": (H, R), "lora_b_q": (R, H),
        "wk": (H, H), "bk": (H,),
        "wv": (H, H), "bv": (H,), "lora_a_v": (H, R), "lora_b_v": (R, H),
        "wo": (H, H), "bo": (H,),
        "ln1_g": (H,), "ln1_b": (H,),
        "wf1": (H, FF), "bf1": (FF,), "wf2": (FF, H), "bf2": (H,),
        "ln2_g": (H,), "ln2_b": (H,),
        "w1": (H, M1), "b1": (M1,),
        "w2": (M1, M2), "b2": (M2,),
        "w3": (M2, C), "b3": (C,),
    }
    keys = jax.random.split(key, len(shapes))
    params = {}
    for (name, shp), k in zip(shapes.items(), keys):
        if name.startswith("ln") and name.endswith("_g"):
            arr = jnp.ones(shp, jnp.float32)
        elif name.startswith("ln") and name.endswith("_b"):
            arr = jnp.zeros(shp, jnp.float32)
        elif name.startswith("b"):   # biases
            arr = (0.01 * jax.random.normal(k, shp)).astype(jnp.float32)
        else:                        # weight matrices / LoRA factors
            arr = (0.05 * jax.random.normal(k, shp)).astype(jnp.float32)
        params[name] = arr
    return params


# ----------------------- main -------------------------------------------------
if __name__ == "__main__":
    key = jax.random.PRNGKey(0)
    k_emb, k_pos, k_par, k_ids = jax.random.split(key, 4)

    emb_table = (0.05 * jax.random.normal(k_emb, (V, H))).astype(jnp.float32)
    pos_emb = (0.05 * jax.random.normal(k_pos, (S, H))).astype(jnp.float32)

    input_ids = jax.random.randint(k_ids, (B, S), 0, V)
    input_ids = input_ids.at[:, 0].set(1)                    # CLS token id
    attention_mask = jnp.ones((B, S), jnp.float32)
    attention_mask = attention_mask.at[1, S - 2:].set(0.0)   # padding on sample 1

    params = init_params(k_par)

    logits = peft_mlp_forward(input_ids, attention_mask, emb_table, pos_emb, params)
    logits = jax.block_until_ready(logits)

    ref = reference_forward(input_ids, attention_mask, emb_table, pos_emb, params)
    assert logits.shape == (B, C)
    assert np.allclose(np.asarray(logits), np.asarray(ref), atol=2e-2, rtol=2e-2)

    print("KERNEL_OK")
</pallas_src>

<mosaic_0001>
module attributes {stable_mosaic.version = 11 : i64} {
  func.func @peft_mlp_kernel(%arg0: memref<856x128xf32, #tpu.memory_space<vmem>>, %arg1: memref<40x128xf32, #tpu.memory_space<vmem>>, %arg2: memref<128x32xf32, #tpu.memory_space<vmem>>, %arg3: memref<8x128xf32, #tpu.memory_space<vmem>>) attributes {dimension_semantics = [], scalar_prefetch = 0 : i64, scratch_operands = 0 : i64, tpu.core_type = #tpu.core_type<tc>} {
    %c0 = arith.constant 0 : index
    %c0_0 = arith.constant 0 : index
    %0 = vector.load %arg1[%c0, %c0_0] : memref<40x128xf32, #tpu.memory_space<vmem>>, vector<16x128xf32>
    %c16 = arith.constant 16 : index
    %c0_1 = arith.constant 0 : index
    %1 = vector.load %arg1[%c16, %c0_1] : memref<40x128xf32, #tpu.memory_space<vmem>>, vector<16x32xf32>
    %c32 = arith.constant 32 : index
    %c0_2 = arith.constant 0 : index
    %2 = vector.load %arg1[%c32, %c0_2] : memref<40x128xf32, #tpu.memory_space<vmem>>, vector<2x8xf32>
    %3 = vector.shape_cast %2 : vector<2x8xf32> to vector<2x1x8xf32>
    %c0_3 = arith.constant 0 : index
    %c0_4 = arith.constant 0 : index
    %4 = vector.load %arg2[%c0_3, %c0_4] : memref<128x32xf32, #tpu.memory_space<vmem>>, vector<128x32xf32>
    %cst = arith.constant dense<0.000000e+00> : vector<16x32xf32>
    %5 = tpu.matmul %0, %4, %cst {dimension_numbers = #tpu.dot_dimension_numbers<[1], [0], [0], [1], [0, 0, 1, 1], [], []>} : vector<16x128xf32>, vector<128x32xf32>, vector<16x32xf32> -> vector<16x32xf32>
    %6 = arith.addf %5, %1 : vector<16x32xf32>
    %c0_5 = arith.constant 0 : index
    %c0_6 = arith.constant 0 : index
    %7 = vector.load %arg0[%c0_5, %c0_6] : memref<856x128xf32, #tpu.memory_space<vmem>>, vector<32x128xf32>
    %cst_7 = arith.constant dense<0.000000e+00> : vector<16x128xf32>
    %8 = tpu.matmul %6, %7, %cst_7 {dimension_numbers = #tpu.dot_dimension_numbers<[1], [0], [0], [1], [0, 0, 1, 1], [], []>} : vector<16x32xf32>, vector<32x128xf32>, vector<16x128xf32> -> vector<16x128xf32>
    %c840 = arith.constant 840 : index
    %c0_8 = arith.constant 0 : index
    %9 = vector.load %arg0[%c840, %c0_8] : memref<856x128xf32, #tpu.memory_space<vmem>>, vector<1x128xf32>
    %10 = vector.broadcast %9 : vector<1x128xf32> to vector<16x128xf32>
    %11 = arith.addf %8, %10 : vector<16x128xf32>
    %c64 = arith.constant 64 : index
    %c0_9 = arith.constant 0 : index
    %12 = vector.load %arg0[%c64, %c0_9] : memref<856x128xf32, #tpu.memory_space<vmem>>, vector<32x128xf32>
    %cst_10 = arith.constant dense<0.000000e+00> : vector<16x128xf32>
    %13 = tpu.matmul %6, %12, %cst_10 {dimension_numbers = #tpu.dot_dimension_numbers<[1], [0], [0], [1], [0, 0, 1, 1], [], []>} : vector<16x32xf32>, vector<32x128xf32>, vector<16x128xf32> -> vector<16x128xf32>
    %c842 = arith.constant 842 : index
    %c0_11 = arith.constant 0 : index
    %14 = vector.load %arg0[%c842, %c0_11] : memref<856x128xf32, #tpu.memory_space<vmem>>, vector<1x128xf32>
    %15 = vector.broadcast %14 : vector<1x128xf32> to vector<16x128xf32>
    %16 = arith.addf %13, %15 : vector<16x128xf32>
    %c128 = arith.constant 128 : index
    %c0_12 = arith.constant 0 : index
    %17 = vector.load %arg0[%c128, %c0_12] : memref<856x128xf32, #tpu.memory_space<vmem>>, vector<32x128xf32>
    %cst_13 = arith.constant dense<0.000000e+00> : vector<16x128xf32>
    %18 = tpu.matmul %6, %17, %cst_13 {dimension_numbers = #tpu.dot_dimension_numbers<[1], [0], [0], [1], [0, 0, 1, 1], [], []>} : vector<16x32xf32>, vector<32x128xf32>, vector<16x128xf32> -> vector<16x128xf32>
    %c844 = arith.constant 844 : index
    %c0_14 = arith.constant 0 : index
    %19 = vector.load %arg0[%c844, %c0_14] : memref<856x128xf32, #tpu.memory_space<vmem>>, vector<1x128xf32>
    %20 = vector.broadcast %19 : vector<1x128xf32> to vector<16x128xf32>
    %21 = arith.addf %18, %20 : vector<16x128xf32>
    %22 = vector.shape_cast %11 : vector<16x128xf32> to vector<2x8x128xf32>
    %23 = vector.shape_cast %16 : vector<16x128xf32> to vector<2x8x128xf32>
    %24 = vector.shape_cast %21 : vector<16x128xf32> to vector<2x8x128xf32>
    "tpu.trace_start"() <{level = 10 : i32, message = "bqd,bkd->bqk"}> : () -> ()
    %cst_15 = arith.constant dense<0.000000e+00> : vector<2x8x8xf32>
    %25 = tpu.matmul %22, %23, %cst_15 {dimension_numbers = #tpu.dot_dimension_numbers<[2], [2], [1], [1], [0, 0, 0, 1, 1, 1], [0], [0]>} : vector<2x8x128xf32>, vector<2x8x128xf32>, vector<2x8x8xf32> -> vector<2x8x8xf32>
    "tpu.trace_stop"() : () -> ()
    %cst_16 = arith.constant 2.500000e-01 : f32
    %26 = vector.broadcast %cst_16 : f32 to vector<2x8x8xf32>
    %27 = arith.mulf %25, %26 : vector<2x8x8xf32>
    %28 = vector.broadcast %3 : vector<2x1x8xf32> to vector<2x8x8xf32>
    %29 = arith.addf %27, %28 : vector<2x8x8xf32>
    %cst_17 = arith.constant dense<0xFF800000> : vector<2x8xf32>
    %30 = vector.multi_reduction <maximumf>, %29, %cst_17 [2] : vector<2x8x8xf32> to vector<2x8xf32>
    %31 = vector.shape_cast %30 : vector<2x8xf32> to vector<2x8x1xf32>
    %32 = vector.broadcast %31 : vector<2x8x1xf32> to vector<2x8x8xf32>
    %33 = arith.subf %29, %32 : vector<2x8x8xf32>
    %34 = math.exp %33 : vector<2x8x8xf32>
    %cst_18 = arith.constant dense<0.000000e+00> : vector<2x8xf32>
    %35 = vector.multi_reduction <add>, %34, %cst_18 [2] : vector<2x8x8xf32> to vector<2x8xf32>
    %36 = vector.shape_cast %35 : vector<2x8xf32> to vector<2x8x1xf32>
    %cst_19 = arith.constant 9.99999997E-7 : f32
    %37 = vector.broadcast %cst_19 : f32 to vector<2x8x1xf32>
    %38 = arith.maximumf %36, %37 : vector<2x8x1xf32>
    %39 = tpu.reciprocal %38 {approx = true} : vector<2x8x1xf32> -> vector<2x8x1xf32>
    %40 = vector.broadcast %39 : vector<2x8x1xf32> to vector<2x8x8xf32>
    %41 = arith.mulf %34, %40 : vector<2x8x8xf32>
    "tpu.trace_start"() <{level = 10 : i32, message = "bqk,bkd->bqd"}> : () -> ()
    %cst_20 = arith.constant dense<0.000000e+00> : vector<2x8x128xf32>
    %42 = tpu.matmul %41, %24, %cst_20 {dimension_numbers = #tpu.dot_dimension_numbers<[2], [1], [1], [2], [0, 0, 0, 1, 1, 2], [0], [0]>} : vector<2x8x8xf32>, vector<2x8x128xf32>, vector<2x8x128xf32> -> vector<2x8x128xf32>
    "tpu.trace_stop"() : () -> ()
    %43 = vector.shape_cast %42 : vector<2x8x128xf32> to vector<16x128xf32>
    %c192 = arith.constant 192 : index
    %c0_21 = arith.constant 0 : index
    %44 = vector.load %arg0[%c192, %c0_21] : memref<856x128xf32, #tpu.memory_space<vmem>>, vector<128x32xf32>
    %cst_22 = arith.constant dense<0.000000e+00> : vector<16x32xf32>
    %45 = tpu.matmul %43, %44, %cst_22 {dimension_numbers = #tpu.dot_dimension_numbers<[1], [0], [0], [1], [0, 0, 1, 1], [], []>} : vector<16x128xf32>, vector<128x32xf32>, vector<16x32xf32> -> vector<16x32xf32>
    %c32_23 = arith.constant 32 : index
    %c0_24 = arith.constant 0 : index
    %46 = vector.load %arg0[%c32_23, %c0_24] : memref<856x128xf32, #tpu.memory_space<vmem>>, vector<32x128xf32>
    %cst_25 = arith.constant dense<0.000000e+00> : vector<16x128xf32>
    %47 = tpu.matmul %6, %46, %cst_25 {dimension_numbers = #tpu.dot_dimension_numbers<[1], [0], [0], [1], [0, 0, 1, 1], [], []>} : vector<16x32xf32>, vector<32x128xf32>, vector<16x128xf32> -> vector<16x128xf32>
    %c841 = arith.constant 841 : index
    %c0_26 = arith.constant 0 : index
    %48 = vector.load %arg0[%c841, %c0_26] : memref<856x128xf32, #tpu.memory_space<vmem>>, vector<1x128xf32>
    %49 = vector.broadcast %48 : vector<1x128xf32> to vector<16x128xf32>
    %50 = arith.addf %47, %49 : vector<16x128xf32>
    %c96 = arith.constant 96 : index
    %c0_27 = arith.constant 0 : index
    %51 = vector.load %arg0[%c96, %c0_27] : memref<856x128xf32, #tpu.memory_space<vmem>>, vector<32x128xf32>
    %cst_28 = arith.constant dense<0.000000e+00> : vector<16x128xf32>
    %52 = tpu.matmul %6, %51, %cst_28 {dimension_numbers = #tpu.dot_dimension_numbers<[1], [0], [0], [1], [0, 0, 1, 1], [], []>} : vector<16x32xf32>, vector<32x128xf32>, vector<16x128xf32> -> vector<16x128xf32>
    %c843 = arith.constant 843 : index
    %c0_29 = arith.constant 0 : index
    %53 = vector.load %arg0[%c843, %c0_29] : memref<856x128xf32, #tpu.memory_space<vmem>>, vector<1x128xf32>
    %54 = vector.broadcast %53 : vector<1x128xf32> to vector<16x128xf32>
    %55 = arith.addf %52, %54 : vector<16x128xf32>
    %c160 = arith.constant 160 : index
    %c0_30 = arith.constant 0 : index
    %56 = vector.load %arg0[%c160, %c0_30] : memref<856x128xf32, #tpu.memory_space<vmem>>, vector<32x128xf32>
    %cst_31 = arith.constant dense<0.000000e+00> : vector<16x128xf32>
    %57 = tpu.matmul %6, %56, %cst_31 {dimension_numbers = #tpu.dot_dimension_numbers<[1], [0], [0], [1], [0, 0, 1, 1], [], []>} : vector<16x32xf32>, vector<32x128xf32>, vector<16x128xf32> -> vector<16x128xf32>
    %c845 = arith.constant 845 : index
    %c0_32 = arith.constant 0 : index
    %58 = vector.load %arg0[%c845, %c0_32] : memref<856x128xf32, #tpu.memory_space<vmem>>, vector<1x128xf32>
    %59 = vector.broadcast %58 : vector<1x128xf32> to vector<16x128xf32>
    %60 = arith.addf %57, %59 : vector<16x128xf32>
    %61 = vector.shape_cast %50 : vector<16x128xf32> to vector<2x8x128xf32>
    %62 = vector.shape_cast %55 : vector<16x128xf32> to vector<2x8x128xf32>
    %63 = vector.shape_cast %60 : vector<16x128xf32> to vector<2x8x128xf32>
    "tpu.trace_start"() <{level = 10 : i32, message = "bqd,bkd->bqk"}> : () -> ()
    %cst_33 = arith.constant dense<0.000000e+00> : vector<2x8x8xf32>
    %64 = tpu.matmul %61, %62, %cst_33 {dimension_numbers = #tpu.dot_dimension_numbers<[2], [2], [1], [1], [0, 0, 0, 1, 1, 1], [0], [0]>} : vector<2x8x128xf32>, vector<2x8x128xf32>, vector<2x8x8xf32> -> vector<2x8x8xf32>
    "tpu.trace_stop"() : () -> ()
    %cst_34 = arith.constant 2.500000e-01 : f32
    %65 = vector.broadcast %cst_34 : f32 to vector<2x8x8xf32>
    %66 = arith.mulf %64, %65 : vector<2x8x8xf32>
    %67 = vector.broadcast %3 : vector<2x1x8xf32> to vector<2x8x8xf32>
    %68 = arith.addf %66, %67 : vector<2x8x8xf32>
    %cst_35 = arith.constant dense<0xFF800000> : vector<2x8xf32>
    %69 = vector.multi_reduction <maximumf>, %68, %cst_35 [2] : vector<2x8x8xf32> to vector<2x8xf32>
    %70 = vector.shape_cast %69 : vector<2x8xf32> to vector<2x8x1xf32>
    %71 = vector.broadcast %70 : vector<2x8x1xf32> to vector<2x8x8xf32>
    %72 = arith.subf %68, %71 : vector<2x8x8xf32>
    %73 = math.exp %72 : vector<2x8x8xf32>
    %cst_36 = arith.constant dense<0.000000e+00> : vector<2x8xf32>
    %74 = vector.multi_reduction <add>, %73, %cst_36 [2] : vector<2x8x8xf32> to vector<2x8xf32>
    %75 = vector.shape_cast %74 : vector<2x8xf32> to vector<2x8x1xf32>
    %cst_37 = arith.constant 9.99999997E-7 : f32
    %76 = vector.broadcast %cst_37 : f32 to vector<2x8x1xf32>
    %77 = arith.maximumf %75, %76 : vector<2x8x1xf32>
    %78 = tpu.reciprocal %77 {approx = true} : vector<2x8x1xf32> -> vector<2x8x1xf32>
    %79 = vector.broadcast %78 : vector<2x8x1xf32> to vector<2x8x8xf32>
    %80 = arith.mulf %73, %79 : vector<2x8x8xf32>
    "tpu.trace_start"() <{level = 10 : i32, message = "bqk,bkd->bqd"}> : () -> ()
    %cst_38 = arith.constant dense<0.000000e+00> : vector<2x8x128xf32>
    %81 = tpu.matmul %80, %63, %cst_38 {dimension_numbers = #tpu.dot_dimension_numbers<[2], [1], [1], [2], [0, 0, 0, 1, 1, 2], [0], [0]>} : vector<2x8x8xf32>, vector<2x8x128xf32>, vector<2x8x128xf32> -> vector<2x8x128xf32>
    "tpu.trace_stop"() : () -> ()
    %82 = vector.shape_cast %81 : vector<2x8x128xf32> to vector<16x128xf32>
    %c320 = arith.constant 320 : index
    %c0_39 = arith.constant 0 : index
    %83 = vector.load %arg0[%c320, %c0_39] : memref<856x128xf32, #tpu.memory_space<vmem>>, vector<128x32xf32>
    %cst_40 = arith.constant dense<0.000000e+00> : vector<16x32xf32>
    %84 = tpu.matmul %82, %83, %cst_40 {dimension_numbers = #tpu.dot_dimension_numbers<[1], [0], [0], [1], [0, 0, 1, 1], [], []>} : vector<16x128xf32>, vector<128x32xf32>, vector<16x32xf32> -> vector<16x32xf32>
    %85 = arith.addf %45, %84 : vector<16x32xf32>
    %c846 = arith.constant 846 : index
    %c0_41 = arith.constant 0 : index
    %86 = vector.load %arg0[%c846, %c0_41] : memref<856x128xf32, #tpu.memory_space<vmem>>, vector<1x32xf32>
    %87 = vector.broadcast %86 : vector<1x32xf32> to vector<16x32xf32>
    %88 = arith.addf %85, %87 : vector<16x32xf32>
    %89 = arith.addf %6, %88 : vector<16x32xf32>
    %c847 = arith.constant 847 : index
    %c0_42 = arith.constant 0 : index
    %90 = vector.load %arg0[%c847, %c0_42] : memref<856x128xf32, #tpu.memory_space<vmem>>, vector<1x32xf32>
    %c848 = arith.constant 848 : index
    %c0_43 = arith.constant 0 : index
    %91 = vector.load %arg0[%c848, %c0_43] : memref<856x128xf32, #tpu.memory_space<vmem>>, vector<1x32xf32>
    %cst_44 = arith.constant dense<0.000000e+00> : vector<16xf32>
    %92 = vector.multi_reduction <add>, %89, %cst_44 [1] : vector<16x32xf32> to vector<16xf32>
    %93 = vector.shape_cast %92 : vector<16xf32> to vector<16x1xf32>
    %cst_45 = arith.constant 3.200000e+01 : f32
    %94 = vector.broadcast %cst_45 : f32 to vector<16x1xf32>
    %95 = arith.divf %93, %94 : vector<16x1xf32>
    %96 = vector.broadcast %95 : vector<16x1xf32> to vector<16x32xf32>
    %97 = arith.subf %89, %96 : vector<16x32xf32>
    %98 = arith.mulf %97, %97 : vector<16x32xf32>
    %cst_46 = arith.constant dense<0.000000e+00> : vector<16xf32>
    %99 = vector.multi_reduction <add>, %98, %cst_46 [1] : vector<16x32xf32> to vector<16xf32>
    %100 = vector.shape_cast %99 : vector<16xf32> to vector<16x1xf32>
    %cst_47 = arith.constant 3.200000e+01 : f32
    %101 = vector.broadcast %cst_47 : f32 to vector<16x1xf32>
    %102 = arith.divf %100, %101 : vector<16x1xf32>
    %103 = vector.broadcast %95 : vector<16x1xf32> to vector<16x32xf32>
    %104 = arith.subf %89, %103 : vector<16x32xf32>
    %cst_48 = arith.constant 9.99999974E-6 : f32
    %105 = vector.broadcast %cst_48 : f32 to vector<16x1xf32>
    %106 = arith.addf %102, %105 : vector<16x1xf32>
    %107 = math.rsqrt %106 : vector<16x1xf32>
    %108 = vector.broadcast %107 : vector<16x1xf32> to vector<16x32xf32>
    %109 = arith.mulf %104, %108 : vector<16x32xf32>
    %110 = vector.broadcast %90 : vector<1x32xf32> to vector<16x32xf32>
    %111 = arith.mulf %109, %110 : vector<16x32xf32>
    %112 = vector.broadcast %91 : vector<1x32xf32> to vector<16x32xf32>
    %113 = arith.addf %111, %112 : vector<16x32xf32>
    %c448 = arith.constant 448 : index
    %c0_49 = arith.constant 0 : index
    %114 = vector.load %arg0[%c448, %c0_49] : memref<856x128xf32, #tpu.memory_space<vmem>>, vector<32x128xf32>
    %cst_50 = arith.constant dense<0.000000e+00> : vector<16x128xf32>
    %115 = tpu.matmul %113, %114, %cst_50 {dimension_numbers = #tpu.dot_dimension_numbers<[1], [0], [0], [1], [0, 0, 1, 1], [], []>} : vector<16x32xf32>, vector<32x128xf32>, vector<16x128xf32> -> vector<16x128xf32>
    %c849 = arith.constant 849 : index
    %c0_51 = arith.constant 0 : index
    %116 = vector.load %arg0[%c849, %c0_51] : memref<856x128xf32, #tpu.memory_space<vmem>>, vector<1x128xf32>
    %117 = vector.broadcast %116 : vector<1x128xf32> to vector<16x128xf32>
    %118 = arith.addf %115, %117 : vector<16x128xf32>
    %cst_52 = arith.constant 5.000000e-01 : f32
    %119 = vector.broadcast %cst_52 : f32 to vector<16x128xf32>
    %120 = arith.mulf %119, %118 : vector<16x128xf32>
    %cst_53 = arith.constant 4.471500e-02 : f32
    %121 = vector.broadcast %cst_53 : f32 to vector<16x128xf32>
    %122 = arith.mulf %121, %118 : vector<16x128xf32>
    %123 = arith.mulf %122, %118 : vector<16x128xf32>
    %124 = arith.mulf %123, %118 : vector<16x128xf32>
    %125 = arith.addf %118, %124 : vector<16x128xf32>
    %cst_54 = arith.constant 0.797884583 : f32
    %126 = vector.broadcast %cst_54 : f32 to vector<16x128xf32>
    %127 = arith.mulf %126, %125 : vector<16x128xf32>
    %128 = math.tanh %127 : vector<16x128xf32>
    %cst_55 = arith.constant 1.000000e+00 : f32
    %129 = vector.broadcast %cst_55 : f32 to vector<16x128xf32>
    %130 = arith.addf %129, %128 : vector<16x128xf32>
    %131 = arith.mulf %120, %130 : vector<16x128xf32>
    %c480 = arith.constant 480 : index
    %c0_56 = arith.constant 0 : index
    %132 = vector.load %arg0[%c480, %c0_56] : memref<856x128xf32, #tpu.memory_space<vmem>>, vector<128x32xf32>
    %cst_57 = arith.constant dense<0.000000e+00> : vector<16x32xf32>
    %133 = tpu.matmul %131, %132, %cst_57 {dimension_numbers = #tpu.dot_dimension_numbers<[1], [0], [0], [1], [0, 0, 1, 1], [], []>} : vector<16x128xf32>, vector<128x32xf32>, vector<16x32xf32> -> vector<16x32xf32>
    %c850 = arith.constant 850 : index
    %c0_58 = arith.constant 0 : index
    %134 = vector.load %arg0[%c850, %c0_58] : memref<856x128xf32, #tpu.memory_space<vmem>>, vector<1x32xf32>
    %135 = vector.broadcast %134 : vector<1x32xf32> to vector<16x32xf32>
    %136 = arith.addf %133, %135 : vector<16x32xf32>
    %137 = arith.addf %113, %136 : vector<16x32xf32>
    %c851 = arith.constant 851 : index
    %c0_59 = arith.constant 0 : index
    %138 = vector.load %arg0[%c851, %c0_59] : memref<856x128xf32, #tpu.memory_space<vmem>>, vector<1x32xf32>
    %c852 = arith.constant 852 : index
    %c0_60 = arith.constant 0 : index
    %139 = vector.load %arg0[%c852, %c0_60] : memref<856x128xf32, #tpu.memory_space<vmem>>, vector<1x32xf32>
    %cst_61 = arith.constant dense<0.000000e+00> : vector<16xf32>
    %140 = vector.multi_reduction <add>, %137, %cst_61 [1] : vector<16x32xf32> to vector<16xf32>
    %141 = vector.shape_cast %140 : vector<16xf32> to vector<16x1xf32>
    %cst_62 = arith.constant 3.200000e+01 : f32
    %142 = vector.broadcast %cst_62 : f32 to vector<16x1xf32>
    %143 = arith.divf %141, %142 : vector<16x1xf32>
    %144 = vector.broadcast %143 : vector<16x1xf32> to vector<16x32xf32>
    %145 = arith.subf %137, %144 : vector<16x32xf32>
    %146 = arith.mulf %145, %145 : vector<16x32xf32>
    %cst_63 = arith.constant dense<0.000000e+00> : vector<16xf32>
    %147 = vector.multi_reduction <add>, %146, %cst_63 [1] : vector<16x32xf32> to vector<16xf32>
    %148 = vector.shape_cast %147 : vector<16xf32> to vector<16x1xf32>
    %cst_64 = arith.constant 3.200000e+01 : f32
    %149 = vector.broadcast %cst_64 : f32 to vector<16x1xf32>
    %150 = arith.divf %148, %149 : vector<16x1xf32>
    %151 = vector.broadcast %143 : vector<16x1xf32> to vector<16x32xf32>
    %152 = arith.subf %137, %151 : vector<16x32xf32>
    %cst_65 = arith.constant 9.99999974E-6 : f32
    %153 = vector.broadcast %cst_65 : f32 to vector<16x1xf32>
    %154 = arith.addf %150, %153 : vector<16x1xf32>
    %155 = math.rsqrt %154 : vector<16x1xf32>
    %156 = vector.broadcast %155 : vector<16x1xf32> to vector<16x32xf32>
    %157 = arith.mulf %152, %156 : vector<16x32xf32>
    %158 = vector.broadcast %138 : vector<1x32xf32> to vector<16x32xf32>
    %159 = arith.mulf %157, %158 : vector<16x32xf32>
    %160 = vector.broadcast %139 : vector<1x32xf32> to vector<16x32xf32>
    %161 = arith.addf %159, %160 : vector<16x32xf32>
    %c608 = arith.constant 608 : index
    %c0_66 = arith.constant 0 : index
    %162 = vector.load %arg0[%c608, %c0_66] : memref<856x128xf32, #tpu.memory_space<vmem>>, vector<32x128xf32>
    %cst_67 = arith.constant dense<0.000000e+00> : vector<16x128xf32>
    %163 = tpu.matmul %161, %162, %cst_67 {dimension_numbers = #tpu.dot_dimension_numbers<[1], [0], [0], [1], [0, 0, 1, 1], [], []>} : vector<16x32xf32>, vector<32x128xf32>, vector<16x128xf32> -> vector<16x128xf32>
    %c853 = arith.constant 853 : index
    %c0_68 = arith.constant 0 : index
    %164 = vector.load %arg0[%c853, %c0_68] : memref<856x128xf32, #tpu.memory_space<vmem>>, vector<1x128xf32>
    %165 = vector.broadcast %164 : vector<1x128xf32> to vector<16x128xf32>
    %166 = arith.addf %163, %165 : vector<16x128xf32>
    %cst_69 = arith.constant 0.000000e+00 : f32
    %167 = vector.broadcast %cst_69 : f32 to vector<16x128xf32>
    %168 = arith.maximumf %166, %167 : vector<16x128xf32>
    %c640 = arith.constant 640 : index
    %c0_70 = arith.constant 0 : index
    %169 = vector.load %arg0[%c640, %c0_70] : memref<856x128xf32, #tpu.memory_space<vmem>>, vector<128x64xf32>
    %cst_71 = arith.constant dense<0.000000e+00> : vector<16x64xf32>
    %170 = tpu.matmul %168, %169, %cst_71 {dimension_numbers = #tpu.dot_dimension_numbers<[1], [0], [0], [1], [0, 0, 1, 1], [], []>} : vector<16x128xf32>, vector<128x64xf32>, vector<16x64xf32> -> vector<16x64xf32>
    %c854 = arith.constant 854 : index
    %c0_72 = arith.constant 0 : index
    %171 = vector.load %arg0[%c854, %c0_72] : memref<856x128xf32, #tpu.memory_space<vmem>>, vector<1x64xf32>
    %172 = vector.broadcast %171 : vector<1x64xf32> to vector<16x64xf32>
    %173 = arith.addf %170, %172 : vector<16x64xf32>
    %cst_73 = arith.constant 0.000000e+00 : f32
    %174 = vector.broadcast %cst_73 : f32 to vector<16x64xf32>
    %175 = arith.maximumf %173, %174 : vector<16x64xf32>
    %c768 = arith.constant 768 : index
    %c0_74 = arith.constant 0 : index
    %176 = vector.load %arg0[%c768, %c0_74] : memref<856x128xf32, #tpu.memory_space<vmem>>, vector<64x128xf32>
    %cst_75 = arith.constant dense<0.000000e+00> : vector<16x128xf32>
    %177 = tpu.matmul %175, %176, %cst_75 {dimension_numbers = #tpu.dot_dimension_numbers<[1], [0], [0], [1], [0, 0, 1, 1], [], []>} : vector<16x64xf32>, vector<64x128xf32>, vector<16x128xf32> -> vector<16x128xf32>
    %c855 = arith.constant 855 : index
    %c0_76 = arith.constant 0 : index
    %178 = vector.load %arg0[%c855, %c0_76] : memref<856x128xf32, #tpu.memory_space<vmem>>, vector<1x128xf32>
    %179 = vector.broadcast %178 : vector<1x128xf32> to vector<16x128xf32>
    %180 = arith.addf %177, %179 : vector<16x128xf32>
    %c832 = arith.constant 832 : index
    %c0_77 = arith.constant 0 : index
    %181 = vector.load %arg0[%c832, %c0_77] : memref<856x128xf32, #tpu.memory_space<vmem>>, vector<8x16xf32>
    %cst_78 = arith.constant dense<0.000000e+00> : vector<8x128xf32>
    %182 = tpu.matmul %181, %180, %cst_78 {dimension_numbers = #tpu.dot_dimension_numbers<[1], [0], [0], [1], [0, 0, 1, 1], [], []>} : vector<8x16xf32>, vector<16x128xf32>, vector<8x128xf32> -> vector<8x128xf32>
    %c0_79 = arith.constant 0 : index
    %c0_80 = arith.constant 0 : index
    %183 = vector.load %arg3[%c0_79, %c0_80] : memref<8x128xf32, #tpu.memory_space<vmem>>, vector<8x128xf32>
    tpu.vector_store %arg3[%c0_79, %c0_80], %182 {strides = array<i32>} : memref<8x128xf32, #tpu.memory_space<vmem>>, vector<8x128xf32>,
    return
  }
}

</mosaic_0001>

<bundles_post_ra>
// kernel: tpu_custom_call.1
= control target key start
LH: loop header
LB: loop body
LE: loop exit
PB: predicated region body
PF: predicated region fallthrough
CT: control target
= control target key end

     0   :  { %8 = vsyncpa [#allocation3], 0  ;;  %s2967_s0 = inlined_call_operand.hbm [shape: f32[856,128], index: 0, kind: input, shape index: {}]   ;;  %s2968_s1 = inlined_call_operand.vmem [shape: f32[40,128], index: 1, kind: input, shape index: {}]   ;;  %s2969_s2 = inlined_call_operand.vmem [shape: f32[128,32], index: 2, kind: input, shape index: {}]   ;;  %s2970_s3 = inlined_call_operand.hbm [shape: f32[8,128], index: 3, kind: output, shape index: {}]  }
   0x1   :  { %9 = vsyncpa [#allocation4], 0  ;;  %s2767_s12 = smov [#allocation2]  }
   0x2   :  { %s15_s13 = sshll.u32 %s2767_s12, 4  ;;  %s16_s13 = int_to_ptr.vmem [resolvable:$true] %s15_s13 }
   0x3   :  { %s2731_s14 = scalar_lea.vmem %s16_s13, 13696  ;;  %p2736_p1 = scmp.lt.s32.totalorder %s16_s13, %s16_s13 }
   0x4   :  { %p2732_p0 = scmp.ne.s32.totalorder %s16_s13, %s2731_s14  ;;  %p2737_p2 = scmp.lt.s32.totalorder %s2731_s14, %s2731_s14 }
   0x6   :  { %p2738_p3 = por %p2737_p2, %p2736_p1 }
   0x8   :  { %p2739_p4 = pnand %p2738_p3, %p2732_p0 }
   0xa   :  { %2742 = shalt.err (!%p2739_p4)
}
   0xb   :  { %s2768_s15 = smov 128   ;;  %s2769_s16 = smov 8  }
   0xc   :  { %21 = dma.hbm_to_vmem [thread:$0]  %s2967_s0, 13696, %s16_s13, [#allocation3], %s2768_s15, %s2768_s15, %s2769_s16  }
   0xd   :  { %2763 = dma.done.wait [#allocation3], 13696  }
   0xe   :  { %2764 = vsyncadd [#allocation3], 4294953600  ;;  %v72_v0 = vld [vmem:[%s2969_s2 + $0x78] sm:$0xff]  ;;  %v71_v1 = vld [vmem:[%s2969_s2 + $0x70] sm:$0xff]  ;;  %vm157_vm0 = vcmask 261120   ;;  %v2770_v36 = vmov 0.0   ;;  %v46_v54 = vlaneseq }
   0xf   :  { %2359 = vmatprep.subr.mxu0 %v72_v0  ;;  %v70_v2 = vld [vmem:[%s2969_s2 + $0x68] sm:$0xff]  ;;  %v69_v3 = vld [vmem:[%s2969_s2 + $0x60] sm:$0xff]  ;;  %v68_v5 = vld [vmem:[%s2969_s2 + $0x58] sm:$0xff]  ;;  %vm2771_vm1 = vmmov 0   ;;  %v2772_v52 = vmov 1966171168  }
  0x10   :  { %2360 = vmatpush3.msra.mxu0 %v72_v0  ;;  %v29_v4 = vld [vmem:[%s2968_s1] sm:$0xff]  ;;  %v151_v6 = vld [vmem:[#allocation2 + $0x18] sm:$0xff]  ;;  %v150_v7 = vld [vmem:[#allocation2 + $0x10] sm:$0xff]  ;;  %v44_v53 = vunpack.c.l.s4 %v2772_v52  ;;  %v47_v56 = vshrl.u32 %v46_v54, 7  ;;  %vm561_vm2 = vcmask 64512   ;;  %vm1979_vm3 = vcmask 523264  }
  0x11   :  { %2361 = vmatprep.subr.mxu0 %v71_v1  ;;  %2391 = vmatprep.mubr.f32.mxu0 %v29_v4  ;;  %v67_v8 = vld [vmem:[%s2969_s2 + $0x50] sm:$0xff]  ;;  %v66_v9 = vld [vmem:[%s2969_s2 + $0x48] sm:$0xff]  ;;  %v65_v10 = vld [vmem:[%s2969_s2 + $0x40] sm:$0xff]  ;;  %vm2062_vm4 = vcmask 130048  }
  0x12   :  { %2362 = vmatpush3.msra.mxu0 %v71_v1  ;;  %2394 = vmatprep.subr.mxu1 %v151_v6  ;;  %v64_v11 = vld [vmem:[%s2969_s2 + $0x38] sm:$0xff]  ;;  %v63_v12 = vld [vmem:[%s2969_s2 + $0x30] sm:$0xff]  ;;  %v62_v13 = vld [vmem:[%s2969_s2 + $0x28] sm:$0xff]  ;;  %v45_v55 = vunpack.c.0.s8 %v44_v53  ;;  %v551_v62 = vsub.s32 0, %v47_v56 }
  0x13   :  { %2363 = vmatprep.subr.mxu0 %v70_v2  ;;  %2395 = vmatpush3.msra.mxu1 %v151_v6  ;;  %v61_v14 = vld [vmem:[%s2969_s2 + $0x20] sm:$0xff]  ;;  %v60_v15 = vld [vmem:[%s2969_s2 + $0x18] sm:$0xff]  ;;  %v59_v16 = vld [vmem:[%s2969_s2 + $0x10] sm:$0xff] }
  0x14   :  { %2364 = vmatpush3.msra.mxu0 %v70_v2  ;;  %2396 = vmatprep.subr.mxu1 %v150_v7  ;;  %v58_v17 = vld [vmem:[%s2969_s2 + $0x8] sm:$0xff]  ;;  %v57_v18 = vld [vmem:[%s2969_s2] sm:$0xff]  ;;  %v242_v22 = vld [vmem:[#allocation2 + $0x58] sm:$0xff]  ;;  %v48_v59 = vsub.s32 %v45_v55, %v47_v56 }
  0x15   :  { %2365 = vmatprep.subr.mxu0 %v69_v3  ;;  %2397 = vmatpush3.msra.mxu1 %v150_v7  ;;  %v30_v19 = vld [vmem:[%s2968_s1 + $0x8] sm:$0xff]  ;;  %v148_v21 = vld [vmem:[#allocation2] sm:$0xff]  ;;  %v31_v24 = vld [vmem:[%s2968_s1 + $0x10] sm:$0xff] }
  0x16   :  { %2366 = vmatpush3.msra.mxu0 %v69_v3  ;;  %v149_v20 = vld [vmem:[#allocation2 + $0x8] sm:$0xff]  ;;  %v32_v25 = vld [vmem:[%s2968_s1 + $0x18] sm:$0xff]  ;;  %v241_v29 = vld [vmem:[#allocation2 + $0x50] sm:$0xff] }
  0x17   :  { %2367 = vmatprep.subr.mxu0 %v68_v5  ;;  %2398 = vmatprep.subr.mxu1 %v149_v20  ;;  %v240_v30 = vld [vmem:[#allocation2 + $0x48] sm:$0xff]  ;;  %v239_v31 = vld [vmem:[#allocation2 + $0x40] sm:$0xff]  ;;  %v326_v32 = vld [vmem:[#allocation2 + $0x98] sm:$0xff] }
  0x18   :  { %2368 = vmatpush3.msra.mxu0 %v68_v5  ;;  %2399 = vmatpush3.msra.mxu1 %v149_v20  ;;  %v325_v33 = vld [vmem:[#allocation2 + $0x90] sm:$0xff]  ;;  %v324_v34 = vld [vmem:[#allocation2 + $0x88] sm:$0xff]  ;;  %v323_v35 = vld [vmem:[#allocation2 + $0x80] sm:$0xff] }
  0x19   :  { %2369 = vmatprep.subr.mxu0 %v67_v8  ;;  %2400 = vmatprep.subr.mxu1 %v148_v21  ;;  %v2156_v40 = vld [vmem:[#allocation2 + $0x34a] ss:$0 sm:$0xff]  ;;  %v2153_v43 = vld [vmem:[#allocation2 + $0x348] ss:$0 sm:$0xff]  ;;  %v2159_v47 = vld [vmem:[#allocation2 + $0x34c] ss:$0 sm:$0xff] }
  0x1a   :  { %2370 = vmatpush3.msra.mxu0 %v67_v8  ;;  %2401 = vmatpush3.msra.mxu1 %v148_v21  ;;  %v2152_v57 = vld.sshfl [vmem:[%s2968_s1 + $0x20] sm:$0x11 pattern:$0x75316420]  ;;  %v835_v21 = vld [vmem:[#allocation2 + $0x78] sm:$0xff]  ;;  %s2773_s1 = smov [#allocation5]  }
  0x1b   :  { %2371 = vmatprep.subr.mxu0 %v66_v9  ;;  %2405 = vmatprep.subr.mxu1 %v242_v22  ;;  %v42_v58 = vcombine.high %v2152_v57, %v2152_v57  ;;  %v49_v63 = vrot.slane %v2152_v57, %v48_v59  ;;  %v2164_v53 = vld [vmem:[#allocation2 + $0x349] ss:$0 sm:$0xff]  ;;  %v2170_v57 = vld [vmem:[#allocation2 + $0x34d] ss:$0 sm:$0xff]  ;;  %s2143_s4 = sshll.u32 %s2773_s1, 4  ;;  %s2144_s4 = int_to_ptr.vmem [resolvable:$true] %s2143_s4 }
  0x1c   :  { %2372 = vmatpush3.msra.mxu0 %v66_v9  ;;  %s2743_s5 = scalar_lea.vmem %s2144_s4, 128  ;;  %p2748_p6 = scmp.lt.s32.totalorder %s2144_s4, %s2144_s4 }
  0x1d   :  { %2373 = vmatprep.subr.mxu0 %v65_v10  ;;  %v56_v60 = vrot.slane %v42_v58, %v48_v59  ;;  %v2890_v5 = vrot.slane %v49_v63, %v551_v62  ;;  %p2744_p5 = scmp.ne.s32.totalorder %s2144_s4, %s2743_s5  ;;  %p2749_p7 = scmp.lt.s32.totalorder %s2743_s5, %s2743_s5 }
  0x1e   :  { %2374 = vmatpush3.msra.mxu0 %v65_v10 }
  0x1f   :  { %2375 = vmatprep.subr.mxu0 %v64_v11  ;;  %v2888_v1 = vrot.slane %v56_v60, %v551_v62  ;;  %p2750_p8 = por %p2749_p7, %p2748_p6 }
  0x20   :  { %2376 = vmatpush3.msra.mxu0 %v64_v11 }
  0x21   :  { %2377 = vmatprep.subr.mxu0 %v63_v12  ;;  %p2751_p9 = pnand %p2750_p8, %p2744_p5 }
  0x22   :  { %2378 = vmatpush3.msra.mxu0 %v63_v12 }
  0x23   :  { %2379 = vmatprep.subr.mxu0 %v62_v13 }
  0x24   :  { %2380 = vmatpush3.msra.mxu0 %v62_v13 }
  0x25   :  { %2381 = vmatprep.subr.mxu0 %v61_v14 }
  0x26   :  { %2382 = vmatpush3.msra.mxu0 %v61_v14 }
  0x27   :  { %2383 = vmatprep.subr.mxu0 %v60_v15 }
  0x28   :  { %2384 = vmatpush3.msra.mxu0 %v60_v15 }
  0x29   :  { %2385 = vmatprep.subr.mxu0 %v59_v16 }
  0x2a   :  { %2386 = vmatpush3.msra.mxu0 %v59_v16 }
  0x2b   :  { %2387 = vmatprep.subr.mxu0 %v58_v17 }
  0x2c   :  { %2388 = vmatpush3.msra.mxu0 %v58_v17 }
  0x2d   :  { %2389 = vmatprep.subr.mxu0 %v57_v18 }
  0x2e   :  { %2390 = vmatpush3.msra.mxu0 %v57_v18 }
  0x2f   :  { %2392 = vmatmul.mubr.f32.vlgmr.msra.gmra.mxu0 %v30_v19  ;;  %2437 = vmatprep.subr.mxu0 %v2770_v36 }
  0x30   :  { %2439 = vmatprep.mubr.msk.f32.mxu0 %vm2771_vm1, %v2770_v36 }
  0xef   :  { %v2393_v23 = vpop.f32.mrf.mxu0 }
  0xf0   :  { %v2859_v28 = vadd.f32 %v2393_v23, %v32_v25 }
  0xf1   :  { %v139_v26 = vpop.f32.mrf.mxu0 }
  0xf2   :  { %v2857_v27 = vadd.f32 %v139_v26, %v31_v24 }
  0xf4   :  { %2402 = vmatprep.mubr.msk.f32.mxu1 %vm157_vm0, %v2857_v27 }
  0xf5   :  { %2403 = vmatmul.mubr.msk.f32.vlgmr.msra.gmra.mxu1 %vm157_vm0, %v2859_v28 }
  0xf6   :  { %2406 = vmatpush3.msra.mxu1 %v242_v22  ;;  %2413 = vmatprep.mubr.msk.f32.mxu1 %vm157_vm0, %v2857_v27  ;;  %v751_v22 = vld [vmem:[#allocation2 + $0x38] sm:$0xff] }
  0xf7   :  { %2407 = vmatprep.subr.mxu1 %v241_v29 }
  0xf8   :  { %2408 = vmatpush3.msra.mxu1 %v241_v29 }
  0xf9   :  { %2409 = vmatprep.subr.mxu1 %v240_v30 }
  0xfa   :  { %2410 = vmatpush3.msra.mxu1 %v240_v30 }
  0xfb   :  { %2411 = vmatprep.subr.mxu1 %v239_v31 }
  0xfc   :  { %2412 = vmatpush3.msra.mxu1 %v239_v31  ;;  %v834_v31 = vld [vmem:[#allocation2 + $0x70] sm:$0xff] }
  0xfd   :  { %2414 = vmatmul.mubr.msk.f32.vlgmr.msra.gmra.mxu1 %vm157_vm0, %v2859_v28  ;;  %2416 = vmatprep.subr.mxu1 %v326_v32 }
  0xfe   :  { %2417 = vmatpush3.msra.mxu1 %v326_v32  ;;  %2424 = vmatprep.mubr.msk.f32.mxu1 %vm157_vm0, %v2857_v27 }
  0xff   :  { %2418 = vmatprep.subr.mxu1 %v325_v33 }
 0x100   :  { %2419 = vmatpush3.msra.mxu1 %v325_v33  ;;  %v833_v33 = vld [vmem:[#allocation2 + $0x68] sm:$0xff] }
 0x101   :  { %2420 = vmatprep.subr.mxu1 %v324_v34 }
 0x102   :  { %2421 = vmatpush3.msra.mxu1 %v324_v34 }
 0x103   :  { %2422 = vmatprep.subr.mxu1 %v323_v35 }
 0x104   :  { %2423 = vmatpush3.msra.mxu1 %v323_v35  ;;  %v750_v35 = vld [vmem:[#allocation2 + $0x30] sm:$0xff] }
 0x105   :  { %2425 = vmatmul.mubr.msk.f32.vlgmr.msra.gmra.mxu1 %vm157_vm0, %v2859_v28  ;;  %2427 = vmatprep.subr.mxu1 %v2770_v36 }
 0x106   :  { %2429 = vmatprep.mubr.msk.f32.mxu1 %vm2771_vm1, %v2770_v36 }
 0x1b5   :  { %v2404_v37 = vpop.f32.mrf.mxu1 }
 0x1b6   :  { %v236_v48 = vadd.f32 %v2404_v37, %v2153_v43  ;;  %v832_v37 = vld [vmem:[#allocation2 + $0x60] sm:$0xff] }
 0x1b7   :  { %v230_v38 = vpop.f32.mrf.mxu1 }
 0x1b8   :  { %v231_v44 = vadd.f32 %v2153_v43, %v230_v38  ;;  %v749_v38 = vld [vmem:[#allocation2 + $0x28] sm:$0xff]  ;;  %v916_v43 = vld [vmem:[#allocation2 + $0xa0] sm:$0xff] }
 0x1bd   :  { %v2415_v39 = vpop.f32.mrf.mxu1 }
 0x1be   :  { %v320_v45 = vadd.f32 %v2415_v39, %v2156_v40  ;;  %v748_v39 = vld [vmem:[#allocation2 + $0x20] sm:$0xff] }
 0x1bf   :  { %v314_v41 = vpop.f32.mrf.mxu1 }
 0x1c0   :  { %v315_v42 = vadd.f32 %v2156_v40, %v314_v41  ;;  %v919_v40 = vld [vmem:[#allocation2 + $0xb8] sm:$0xff]  ;;  %v918_v41 = vld [vmem:[#allocation2 + $0xb0] sm:$0xff] }
 0x1c2   :  { %2428 = vmatpush3.xpose.msra.mxu1 %v315_v42  ;;  %v917_v42 = vld [vmem:[#allocation2 + $0xa8] sm:$0xff] }
 0x1c3   :  { %2432 = vmatprep.subr.mxu1 %v2770_v36 }
 0x1c5   :  { %v2426_v46 = vpop.f32.mrf.mxu1  ;;  %2430 = vmatmul.mubr.f32.vlgmr.msra.gmra.mxu1 %v231_v44 }
 0x1c6   :  { %2433 = vmatpush3.xpose.msra.mxu1 %v320_v45  ;;  %2434 = vmatprep.mubr.msk.f32.mxu1 %vm2771_vm1, %v2770_v36  ;;  %v404_v50 = vadd.f32 %v2426_v46, %v2159_v47 }
 0x1c7   :  { %v398_v49 = vpop.f32.mrf.mxu1  ;;  %2442 = vmatprep.subr.mxu1 %v2770_v36 }
 0x1c8   :  { %v399_v51 = vadd.f32 %v2159_v47, %v398_v49  ;;  %v2167_v49 = vld [vmem:[#allocation2 + $0x34b] ss:$0 sm:$0xff] }
 0x1c9   :  { %2435 = vmatmul.mubr.f32.vlgmr.msra.gmra.mxu1 %v236_v48 }
 0x1ca   :  { %2438 = vmatpush3.msra.mxu0 %v399_v51  ;;  %2443 = vmatpush3.msra.mxu1 %v404_v50 }
 0x1cb   :  { %2444 = vmatprep.mubr.msk.f32.mxu1 %vm2771_vm1, %v2770_v36  ;;  %2458 = vmatprep.subr.mxu1 %v835_v21 }
 0x1cc   :  { %2447 = vmatprep.subr.mxu0 %v751_v22 }
 0x285   :  { %v473_v61 = vpop.f32.mrf.mxu1 }
 0x286   :  { %v547_v3 = vmul.f32 0.25, %v473_v61 }
 0x287   :  { %v2431_v0 = vpop.f32.mrf.mxu1 }
 0x288   :  { %v559_v9 = vadd.f32 %v2890_v5, %v547_v3 }
 0x289   :  { %v543_v2 = vpop.f32.mrf.mxu1 }
 0x28a   :  { %v548_v4 = vmul.f32 0.25, %v543_v2  ;;  %v562_v10 = vsel %vm561_vm2, %v559_v9, -inf }
 0x28b   :  { %v2436_v6 = vpop.f32.mrf.mxu1 }
 0x28c   :  { %v560_v7 = vadd.f32 %v2888_v1, %v548_v4 }
 0x28e   :  { %v565_v8 = vsel %vm561_vm2, %v560_v7, -inf }
 0x28f   :  { %566 = vmax.xlane.f32.xlu0 %v565_v8 }
 0x293   :  { %563 = vmax.xlane.f32.xlu0 %v562_v10 }
 0x318   :  { %v567_v11 = vpop.xlane.xlu0 %566 }
 0x319   :  { %v569_v12 = vsub.f32 %v560_v7, %v567_v11 }
 0x31b   :  { %v572_v13 = vmul.f32 1.442695, %v569_v12 }
 0x31c   :  { %v564_v14 = vpop.xlane.xlu0 %563 }
 0x31d   :  { %2695 = vpow2.f32 %v572_v13  ;;  %v568_v15 = vsub.f32 %v559_v9, %v564_v14 }
 0x31f   :  { %v570_v16 = vmul.f32 1.442695, %v568_v15 }
 0x321   :  { %2697 = vpow2.f32 %v570_v16 }
 0x32a   :  { %v2696_v17 = vpop.eup %2695 }
 0x32b   :  { %v577_v18 = vsel %vm561_vm2, %v2696_v17, 0.0 }
 0x32c   :  { %578 = vadd.xlane.f32.xlu1 %v577_v18 }
 0x32e   :  { %v2698_v19 = vpop.eup %2697 }
 0x32f   :  { %v574_v20 = vsel %vm561_vm2, %v2698_v19, 0.0 }
 0x330   :  { %575 = vadd.xlane.f32.xlu1 %v574_v20  ;;  %v1329_v20 = vld [vmem:[#allocation2 + $0x1b8] sm:$0xff] }
 0x3b5   :  { %v579_v23 = vpop.xlane.xlu1 %578 }
 0x3b6   :  { %v581_v24 = vmax.f32 %v579_v23, 1e-06 }
 0x3b8   :  { %2699 = vrcp.f32 %v581_v24 }
 0x3b9   :  { %v576_v25 = vpop.xlane.xlu1 %575 }
 0x3ba   :  { %v580_v26 = vmax.f32 %v576_v25, 1e-06 }
 0x3bc   :  { %2701 = vrcp.f32 %v580_v26 }
 0x3c5   :  { %v2700_v29 = vpop.eup %2699 }
 0x3c6   :  { %v585_v30 = vmul.f32 %v2700_v29, %v2696_v17  ;;  %v1328_v29 = vld [vmem:[#allocation2 + $0x1b0] sm:$0xff] }
 0x3c8   :  { %2445 = vmatmul.mubr.msk.f32.vlgmr.msra.gmra.mxu1 %vm561_vm2, %v585_v30 }
 0x3c9   :  { %v2702_v32 = vpop.eup %2701  ;;  %2459 = vmatpush3.msra.mxu1 %v835_v21  ;;  %2466 = vmatprep.mubr.msk.f32.mxu1 %vm157_vm0, %v2857_v27 }
 0x3ca   :  { %2460 = vmatprep.subr.mxu1 %v834_v31  ;;  %v584_v34 = vmul.f32 %v2702_v32, %v2698_v19 }
 0x3cb   :  { %2461 = vmatpush3.msra.mxu1 %v834_v31  ;;  %v1327_v31 = vld [vmem:[#allocation2 + $0x1a8] sm:$0xff] }
 0x3cc   :  { %2462 = vmatprep.subr.mxu1 %v833_v33  ;;  %2440 = vmatmul.mubr.msk.f32.vlgmr.msra.gmra.mxu0 %vm561_vm2, %v584_v34  ;;  %v1326_v34 = vld [vmem:[#allocation2 + $0x1a0] sm:$0xff] }
 0x3cd   :  { %2448 = vmatpush3.msra.mxu0 %v751_v22  ;;  %2463 = vmatpush3.msra.mxu1 %v833_v33  ;;  %v746_v33 = vld [vmem:[#allocation2 + $0x130] sm:$0xff] }
 0x3ce   :  { %2449 = vmatprep.subr.mxu0 %v750_v35  ;;  %2455 = vmatprep.mubr.msk.f32.mxu0 %vm157_vm0, %v2857_v27 }
 0x3cf   :  { %2464 = vmatprep.subr.mxu1 %v832_v37  ;;  %2450 = vmatpush3.msra.mxu0 %v750_v35  ;;  %v745_v35 = vld [vmem:[#allocation2 + $0x128] sm:$0xff] }
 0x3d0   :  { %2465 = vmatpush3.msra.mxu1 %v832_v37  ;;  %2451 = vmatprep.subr.mxu0 %v749_v38  ;;  %v1325_v37 = vld [vmem:[#allocation2 + $0x198] sm:$0xff] }
 0x3d1   :  { %2467 = vmatmul.mubr.msk.f32.vlgmr.msra.gmra.mxu1 %vm157_vm0, %v2859_v28  ;;  %2452 = vmatpush3.msra.mxu0 %v749_v38  ;;  %v744_v38 = vld [vmem:[#allocation2 + $0x120] sm:$0xff] }
 0x3d2   :  { %2453 = vmatprep.subr.mxu0 %v748_v39  ;;  %2480 = vmatprep.subr.mxu1 %v2770_v36 }
 0x3d3   :  { %2454 = vmatpush3.msra.mxu0 %v748_v39  ;;  %2482 = vmatprep.mubr.msk.f32.mxu1 %vm2771_vm1, %v2770_v36  ;;  %v1324_v39 = vld [vmem:[#allocation2 + $0x190] sm:$0xff] }
 0x3d4   :  { %2456 = vmatmul.mubr.msk.f32.vlgmr.msra.gmra.mxu0 %vm157_vm0, %v2859_v28  ;;  %2469 = vmatprep.subr.mxu0 %v919_v40 }
 0x3d5   :  { %2470 = vmatpush3.msra.mxu0 %v919_v40  ;;  %2477 = vmatprep.mubr.msk.f32.mxu0 %vm157_vm0, %v2857_v27  ;;  %v743_v40 = vld [vmem:[#allocation2 + $0x118] sm:$0xff] }
 0x3d6   :  { %2471 = vmatprep.subr.mxu0 %v918_v41 }
 0x3d7   :  { %2472 = vmatpush3.msra.mxu0 %v918_v41  ;;  %v1323_v41 = vld [vmem:[#allocation2 + $0x188] sm:$0xff] }
 0x3d8   :  { %2473 = vmatprep.subr.mxu0 %v917_v42 }
 0x3d9   :  { %2474 = vmatpush3.msra.mxu0 %v917_v42  ;;  %v742_v42 = vld [vmem:[#allocation2 + $0x110] sm:$0xff] }
 0x3da   :  { %2475 = vmatprep.subr.mxu0 %v916_v43 }
 0x3db   :  { %2476 = vmatpush3.msra.mxu0 %v916_v43  ;;  %v1322_v43 = vld [vmem:[#allocation2 + $0x180] sm:$0xff] }
 0x3dc   :  { %2478 = vmatmul.mubr.msk.f32.vlgmr.msra.gmra.mxu0 %vm157_vm0, %v2859_v28  ;;  %2490 = vmatprep.subr.mxu0 %v2770_v36 }
 0x3dd   :  { %2492 = vmatprep.mubr.msk.f32.mxu0 %vm2771_vm1, %v2770_v36 }
 0x488   :  { %v2918_v44 = vpop.f32.mrf.mxu1 }
 0x48a   :  { %v2446_v45 = vpop.f32.mrf.mxu1 }
 0x48b   :  { %v741_v45 = vld [vmem:[#allocation2 + $0x108] sm:$0xff] }
 0x48c   :  { %v2920_v46 = vpop.f32.mrf.mxu0 }
 0x48e   :  { %v2441_v47 = vpop.f32.mrf.mxu0 }
 0x48f   :  { %v740_v47 = vld [vmem:[#allocation2 + $0x100] sm:$0xff] }
 0x491   :  { %v2468_v48 = vpop.f32.mrf.mxu1 }
 0x492   :  { %v913_v56 = vadd.f32 %v2468_v48, %v2167_v49  ;;  %v1320_v48 = vld [vmem:[#allocation2 + $0x170] sm:$0xff] }
 0x493   :  { %v907_v50 = vpop.f32.mrf.mxu1 }
 0x494   :  { %v908_v51 = vadd.f32 %v2167_v49, %v907_v50  ;;  %v2457_v52 = vpop.f32.mrf.mxu0  ;;  %v739_v49 = vld [vmem:[#allocation2 + $0xf8] sm:$0xff]  ;;  %v1319_v50 = vld [vmem:[#allocation2 + $0x168] sm:$0xff] }
 0x495   :  { %v829_v58 = vadd.f32 %v2457_v52, %v2164_v53  ;;  %v1318_v52 = vld [vmem:[#allocation2 + $0x160] sm:$0xff] }
 0x496   :  { %2481 = vmatpush3.xpose.msra.mxu1 %v908_v51  ;;  %v823_v54 = vpop.f32.mrf.mxu0  ;;  %v738_v51 = vld [vmem:[#allocation2 + $0xf0] sm:$0xff] }
 0x497   :  { %v824_v55 = vadd.f32 %v2164_v53, %v823_v54  ;;  %2485 = vmatprep.subr.mxu1 %v2770_v36  ;;  %v737_v53 = vld [vmem:[#allocation2 + $0xe8] sm:$0xff]  ;;  %v1317_v54 = vld [vmem:[#allocation2 + $0x158] sm:$0xff] }
 0x499   :  { %2483 = vmatmul.mubr.f32.vlgmr.msra.gmra.mxu1 %v824_v55  ;;  %v736_v55 = vld [vmem:[#allocation2 + $0xe0] sm:$0xff] }
 0x49a   :  { %2486 = vmatpush3.xpose.msra.mxu1 %v913_v56  ;;  %2487 = vmatprep.mubr.msk.f32.mxu1 %vm2771_vm1, %v2770_v36  ;;  %v1316_v56 = vld [vmem:[#allocation2 + $0x150] sm:$0xff] }
 0x49b   :  { %2495 = vmatprep.subr.mxu1 %v2770_v36 }
 0x49c   :  { %v2479_v59 = vpop.f32.mrf.mxu0 }
 0x49d   :  { %v997_v60 = vadd.f32 %v2479_v59, %v2170_v57  ;;  %2488 = vmatmul.mubr.f32.vlgmr.msra.gmra.mxu1 %v829_v58  ;;  %v734_v58 = vld [vmem:[#allocation2 + $0xd0] sm:$0xff]  ;;  %v733_v59 = vld [vmem:[#allocation2 + $0xc8] sm:$0xff] }
 0x49e   :  { %v991_v61 = vpop.f32.mrf.mxu0  ;;  %2497 = vmatprep.mubr.msk.f32.mxu1 %vm2771_vm1, %v2770_v36 }
 0x49f   :  { %v992_v62 = vadd.f32 %v2170_v57, %v991_v61  ;;  %2496 = vmatpush3.msra.mxu1 %v997_v60  ;;  %v735_v57 = vld [vmem:[#allocation2 + $0xd8] sm:$0xff]  ;;  %v732_v60 = vld [vmem:[#allocation2 + $0xc0] sm:$0xff]  ;;  %v1315_v61 = vld [vmem:[#allocation2 + $0x148] sm:$0xff] }
 0x4a1   :  { %2491 = vmatpush3.msra.mxu0 %v992_v62  ;;  %v1314_v62 = vld [vmem:[#allocation2 + $0x140] sm:$0xff] }
 0x4a2   :  { %2500 = vmatprep.subr.mxu0 %v1329_v20 }
 0x559   :  { %v1066_v63 = vpop.f32.mrf.mxu1 }
 0x55a   :  { %v1140_v0 = vmul.f32 0.25, %v1066_v63 }
 0x55b   :  { %v2484_v2 = vpop.f32.mrf.mxu1 }
 0x55c   :  { %v1142_v3 = vadd.f32 %v1140_v0, %v2890_v5 }
 0x55d   :  { %v1136_v4 = vpop.f32.mrf.mxu1 }
 0x55e   :  { %v1141_v6 = vmul.f32 0.25, %v1136_v4  ;;  %v1144_v7 = vsel %vm561_vm2, %v1142_v3, -inf }
 0x55f   :  { %1145 = vmax.xlane.f32.xlu0 %v1144_v7  ;;  %v2489_v8 = vpop.f32.mrf.mxu1  ;;  %v2175_v7 = vld [vmem:[#allocation2 + $0x34e] ss:$0 sm:$0xff] }
 0x560   :  { %v1143_v9 = vadd.f32 %v1141_v6, %v2888_v1  ;;  %v747_v1 = vld [vmem:[#allocation2 + $0x138] sm:$0xff] }
 0x561   :  { %2535 = vmatprep.subr.mxu1 %v747_v1 }
 0x562   :  { %v1147_v10 = vsel %vm561_vm2, %v1143_v9, -inf }
 0x563   :  { %1148 = vmax.xlane.f32.xlu1 %v1147_v10 }
 0x5e8   :  { %v1146_v11 = vpop.xlane.xlu0 %1145 }
 0x5e9   :  { %v1150_v12 = vsub.f32 %v1142_v3, %v1146_v11 }
 0x5eb   :  { %v1152_v13 = vmul.f32 1.442695, %v1150_v12 }
 0x5ec   :  { %v1149_v14 = vpop.xlane.xlu1 %1148 }
 0x5ed   :  { %2703 = vpow2.f32 %v1152_v13  ;;  %v1151_v15 = vsub.f32 %v1143_v9, %v1149_v14 }
 0x5ef   :  { %v1154_v16 = vmul.f32 1.442695, %v1151_v15 }
 0x5f1   :  { %2705 = vpow2.f32 %v1154_v16 }
 0x5fa   :  { %v2704_v5 = vpop.eup %2703 }
 0x5fb   :  { %v1156_v17 = vsel %vm561_vm2, %v2704_v5, 0.0 }
 0x5fc   :  { %1157 = vadd.xlane.f32.xlu0 %v1156_v17 }
 0x5fe   :  { %v2706_v18 = vpop.eup %2705 }
 0x5ff   :  { %v1159_v19 = vsel %vm561_vm2, %v2706_v18, 0.0 }
 0x600   :  { %1160 = vadd.xlane.f32.xlu1 %v1159_v19 }
 0x685   :  { %v1158_v21 = vpop.xlane.xlu0 %1157 }
 0x686   :  { %v1162_v22 = vmax.f32 %v1158_v21, 1e-06 }
 0x688   :  { %2707 = vrcp.f32 %v1162_v22 }
 0x689   :  { %v1161_v23 = vpop.xlane.xlu1 %1160 }
 0x68a   :  { %v1163_v24 = vmax.f32 %v1161_v23, 1e-06 }
 0x68c   :  { %2709 = vrcp.f32 %v1163_v24  ;;  %v1533_v24 = vld [vmem:[#allocation2 + $0x1d8] sm:$0xff] }
 0x695   :  { %v2708_v25 = vpop.eup %2707 }
 0x696   :  { %v1166_v26 = vmul.f32 %v2708_v25, %v2704_v5  ;;  %v1531_v25 = vld [vmem:[#allocation2 + $0x1c8] sm:$0xff] }
 0x698   :  { %2493 = vmatmul.mubr.msk.f32.vlgmr.msra.gmra.mxu0 %vm561_vm2, %v1166_v26  ;;  %v1530_v26 = vld [vmem:[#allocation2 + $0x1c0] sm:$0xff] }
 0x699   :  { %v2710_v30 = vpop.eup %2709  ;;  %2501 = vmatpush3.msra.mxu0 %v1329_v20 }
 0x69a   :  { %v1167_v32 = vmul.f32 %v2710_v30, %v2706_v18  ;;  %2502 = vmatprep.subr.mxu0 %v1328_v29 }
 0x69b   :  { %2503 = vmatpush3.msra.mxu0 %v1328_v29 }
 0x69c   :  { %2498 = vmatmul.mubr.msk.f32.vlgmr.msra.gmra.mxu1 %vm561_vm2, %v1167_v32  ;;  %2504 = vmatprep.subr.mxu0 %v1327_v31 }
 0x69d   :  { %2536 = vmatpush3.msra.mxu1 %v747_v1  ;;  %2567 = vmatprep.mubr.f32.mxu1 %v2920_v46  ;;  %v1321_v46 = vld [vmem:[#allocation2 + $0x178] sm:$0xff] }
 0x69e   :  { %2537 = vmatprep.subr.mxu1 %v746_v33  ;;  %2505 = vmatpush3.msra.mxu0 %v1327_v31 }
 0x69f   :  { %2538 = vmatpush3.msra.mxu1 %v746_v33  ;;  %2506 = vmatprep.subr.mxu0 %v1326_v34 }
 0x6a0   :  { %2539 = vmatprep.subr.mxu1 %v745_v35  ;;  %2507 = vmatpush3.msra.mxu0 %v1326_v34 }
 0x6a1   :  { %2540 = vmatpush3.msra.mxu1 %v745_v35  ;;  %2508 = vmatprep.subr.mxu0 %v1325_v37 }
 0x6a2   :  { %2541 = vmatprep.subr.mxu1 %v744_v38  ;;  %2509 = vmatpush3.msra.mxu0 %v1325_v37  ;;  %v2176_v37 = vld [vmem:[#allocation2 + $0x34f] ss:$0 sm:$0xff] }
 0x6a3   :  { %2542 = vmatpush3.msra.mxu1 %v744_v38  ;;  %2510 = vmatprep.subr.mxu0 %v1324_v39 }
 0x6a4   :  { %2543 = vmatprep.subr.mxu1 %v743_v40  ;;  %2511 = vmatpush3.msra.mxu0 %v1324_v39 }
 0x6a5   :  { %2544 = vmatpush3.msra.mxu1 %v743_v40  ;;  %2512 = vmatprep.subr.mxu0 %v1323_v41 }
 0x6a6   :  { %2545 = vmatprep.subr.mxu1 %v742_v42  ;;  %2513 = vmatpush3.msra.mxu0 %v1323_v41 }
 0x6a7   :  { %2546 = vmatpush3.msra.mxu1 %v742_v42  ;;  %2514 = vmatprep.subr.mxu0 %v1322_v43  ;;  %v2177_v42 = vld [vmem:[#allocation2 + $0x350] ss:$0 sm:$0xff] }
 0x6a8   :  { %2547 = vmatprep.subr.mxu1 %v741_v45  ;;  %2515 = vmatpush3.msra.mxu0 %v1322_v43 }
 0x6a9   :  { %2548 = vmatpush3.msra.mxu1 %v741_v45  ;;  %2516 = vmatprep.subr.mxu0 %v1321_v46 }
 0x6aa   :  { %2549 = vmatprep.subr.mxu1 %v740_v47  ;;  %2517 = vmatpush3.msra.mxu0 %v1321_v46 }
 0x6ab   :  { %2550 = vmatpush3.msra.mxu1 %v740_v47  ;;  %2518 = vmatprep.subr.mxu0 %v1320_v48  ;;  %v1653_v47 = vld [vmem:[#allocation2 + $0x258] sm:$0xff] }
 0x6ac   :  { %2551 = vmatprep.subr.mxu1 %v739_v49  ;;  %2519 = vmatpush3.msra.mxu0 %v1320_v48  ;;  %v1652_v48 = vld [vmem:[#allocation2 + $0x250] sm:$0xff] }
 0x6ad   :  { %2552 = vmatpush3.msra.mxu1 %v739_v49  ;;  %2520 = vmatprep.subr.mxu0 %v1319_v50  ;;  %v1651_v49 = vld [vmem:[#allocation2 + $0x248] sm:$0xff] }
 0x6ae   :  { %2553 = vmatprep.subr.mxu1 %v738_v51  ;;  %2521 = vmatpush3.msra.mxu0 %v1319_v50  ;;  %v1650_v50 = vld [vmem:[#allocation2 + $0x240] sm:$0xff] }
 0x6af   :  { %2554 = vmatpush3.msra.mxu1 %v738_v51  ;;  %2522 = vmatprep.subr.mxu0 %v1318_v52  ;;  %v1649_v51 = vld [vmem:[#allocation2 + $0x238] sm:$0xff] }
 0x6b0   :  { %2555 = vmatprep.subr.mxu1 %v737_v53  ;;  %2523 = vmatpush3.msra.mxu0 %v1318_v52  ;;  %v1648_v52 = vld [vmem:[#allocation2 + $0x230] sm:$0xff] }
 0x6b1   :  { %2556 = vmatpush3.msra.mxu1 %v737_v53  ;;  %2524 = vmatprep.subr.mxu0 %v1317_v54  ;;  %v1647_v53 = vld [vmem:[#allocation2 + $0x228] sm:$0xff] }
 0x6b2   :  { %2557 = vmatprep.subr.mxu1 %v736_v55  ;;  %2525 = vmatpush3.msra.mxu0 %v1317_v54  ;;  %v1646_v54 = vld [vmem:[#allocation2 + $0x220] sm:$0xff] }
 0x6b3   :  { %2558 = vmatpush3.msra.mxu1 %v736_v55  ;;  %2526 = vmatprep.subr.mxu0 %v1316_v56  ;;  %v1645_v55 = vld [vmem:[#allocation2 + $0x218] sm:$0xff] }
 0x6b4   :  { %2559 = vmatprep.subr.mxu1 %v735_v57  ;;  %2527 = vmatpush3.msra.mxu0 %v1316_v56  ;;  %v1644_v56 = vld [vmem:[#allocation2 + $0x210] sm:$0xff] }
 0x6b5   :  { %2560 = vmatpush3.msra.mxu1 %v735_v57  ;;  %2528 = vmatprep.subr.mxu0 %v1315_v61  ;;  %v1643_v57 = vld [vmem:[#allocation2 + $0x208] sm:$0xff] }
 0x6b6   :  { %2561 = vmatprep.subr.mxu1 %v734_v58  ;;  %2529 = vmatpush3.msra.mxu0 %v1315_v61  ;;  %v1639_v61 = vld [vmem:[#allocation2 + $0x1e8] sm:$0xff] }
 0x6b7   :  { %2562 = vmatpush3.msra.mxu1 %v734_v58  ;;  %2530 = vmatprep.subr.mxu0 %v1314_v62  ;;  %v1642_v58 = vld [vmem:[#allocation2 + $0x200] sm:$0xff] }
 0x6b8   :  { %2563 = vmatprep.subr.mxu1 %v733_v59  ;;  %2531 = vmatpush3.msra.mxu0 %v1314_v62  ;;  %v1638_v62 = vld [vmem:[#allocation2 + $0x1e0] sm:$0xff] }
 0x6b9   :  { %2564 = vmatpush3.msra.mxu1 %v733_v59  ;;  %2570 = vmatprep.subr.mxu0 %v1533_v24  ;;  %v1641_v59 = vld [vmem:[#allocation2 + $0x1f8] sm:$0xff] }
 0x6ba   :  { %2565 = vmatprep.subr.mxu1 %v732_v60 }
 0x6bb   :  { %2566 = vmatpush3.msra.mxu1 %v732_v60  ;;  %v1640_v60 = vld [vmem:[#allocation2 + $0x1f0] sm:$0xff] }
 0x6bc   :  { %2568 = vmatmul.mubr.f32.vlgmr.msra.gmra.mxu1 %v2918_v44  ;;  %2581 = vmatprep.subr.mxu1 %v1653_v47 }
 0x6bd   :  { %2582 = vmatpush3.msra.mxu1 %v1653_v47 }
 0x6be   :  { %2583 = vmatprep.subr.mxu1 %v1652_v48 }
 0x6bf   :  { %2584 = vmatpush3.msra.mxu1 %v1652_v48 }
 0x6c0   :  { %2585 = vmatprep.subr.mxu1 %v1651_v49 }
 0x6c1   :  { %2586 = vmatpush3.msra.mxu1 %v1651_v49 }
 0x6c2   :  { %2587 = vmatprep.subr.mxu1 %v1650_v50 }
 0x6c3   :  { %2588 = vmatpush3.msra.mxu1 %v1650_v50 }
 0x6c4   :  { %2589 = vmatprep.subr.mxu1 %v1649_v51 }
 0x6c5   :  { %2590 = vmatpush3.msra.mxu1 %v1649_v51 }
 0x6c6   :  { %2591 = vmatprep.subr.mxu1 %v1648_v52 }
 0x6c7   :  { %2592 = vmatpush3.msra.mxu1 %v1648_v52 }
 0x6c8   :  { %2593 = vmatprep.subr.mxu1 %v1647_v53 }
 0x6c9   :  { %2594 = vmatpush3.msra.mxu1 %v1647_v53 }
 0x6ca   :  { %2595 = vmatprep.subr.mxu1 %v1646_v54 }
 0x6cb   :  { %2596 = vmatpush3.msra.mxu1 %v1646_v54  ;;  %v2182_v54 = vld [vmem:[#allocation2 + $0x353] ss:$0 sm:$0xff] }
 0x6cc   :  { %2597 = vmatprep.subr.mxu1 %v1645_v55 }
 0x6cd   :  { %2598 = vmatpush3.msra.mxu1 %v1645_v55 }
 0x6ce   :  { %2599 = vmatprep.subr.mxu1 %v1644_v56 }
 0x6cf   :  { %2600 = vmatpush3.msra.mxu1 %v1644_v56 }
 0x6d0   :  { %2601 = vmatprep.subr.mxu1 %v1643_v57 }
 0x6d1   :  { %2602 = vmatpush3.msra.mxu1 %v1643_v57 }
 0x6d2   :  { %2603 = vmatprep.subr.mxu1 %v1642_v58 }
 0x6d3   :  { %2604 = vmatpush3.msra.mxu1 %v1642_v58 }
 0x6d4   :  { %2605 = vmatprep.subr.mxu1 %v1641_v59 }
 0x6d5   :  { %2606 = vmatpush3.msra.mxu1 %v1641_v59  ;;  %v2183_v59 = vld [vmem:[#allocation2 + $0x354] ss:$0 sm:$0xff] }
 0x6d6   :  { %2607 = vmatprep.subr.mxu1 %v1640_v60 }
 0x6d7   :  { %2608 = vmatpush3.msra.mxu1 %v1640_v60 }
 0x6d8   :  { %2609 = vmatprep.subr.mxu1 %v1639_v61 }
 0x6d9   :  { %2610 = vmatpush3.msra.mxu1 %v1639_v61 }
 0x6da   :  { %2611 = vmatprep.subr.mxu1 %v1638_v62 }
 0x6db   :  { %2612 = vmatpush3.msra.mxu1 %v1638_v62 }
 0x758   :  { %v1237_v63 = vpop.f32.mrf.mxu0 }
 0x759   :  { %2532 = vmatprep.mubr.f32.mxu0 %v1237_v63  ;;  %v2178_v63 = vld [vmem:[#allocation2 + $0x351] ss:$0 sm:$0xff] }
 0x75a   :  { %v2494_v0 = vpop.f32.mrf.mxu0 }
 0x75c   :  { %v1310_v2 = vpop.f32.mrf.mxu1 }
 0x75d   :  { %2533 = vmatmul.mubr.f32.vlgmr.msra.gmra.mxu0 %v1310_v2 }
 0x75e   :  { %v2499_v3 = vpop.f32.mrf.mxu1  ;;  %2571 = vmatpush3.msra.mxu0 %v1533_v24 }
 0x77c   :  { %v2569_v4 = vpop.f32.mrf.mxu1 }
 0x77e   :  { %v1471_v9 = vpop.f32.mrf.mxu1 }
 0x81d   :  { %v2534_v6 = vpop.f32.mrf.mxu0 }
 0x81e   :  { %v1477_v8 = vadd.f32 %v2569_v4, %v2534_v6 }
 0x81f   :  { %v1396_v10 = vpop.f32.mrf.mxu0 }
 0x820   :  { %v1486_v11 = vadd.f32 %v2175_v7, %v1477_v8  ;;  %v1472_v44 = vadd.f32 %v1471_v9, %v1396_v10 }
 0x822   :  { %v1485_v12 = vadd.f32 %v2175_v7, %v1472_v44  ;;  %v1488_v13 = vadd.f32 %v1486_v11, %v2859_v28 }
 0x824   :  { %v1494_v14 = vsel %vm157_vm0, %v1488_v13, 0.0  ;;  %v1487_v15 = vadd.f32 %v1485_v12, %v2857_v27  ;;  %v1532_v27 = vld [vmem:[#allocation2 + $0x1d0] sm:$0xff] }
 0x825   :  { %1495 = vadd.xlane.f32.xlu1 %v1494_v14  ;;  %2572 = vmatprep.subr.mxu0 %v1532_v27 }
 0x826   :  { %v1491_v16 = vsel %vm157_vm0, %v1487_v15, 0.0  ;;  %2573 = vmatpush3.msra.mxu0 %v1532_v27 }
 0x827   :  { %1492 = vadd.xlane.f32.xlu0 %v1491_v16  ;;  %2574 = vmatprep.subr.mxu0 %v1531_v25 }
 0x828   :  { %2575 = vmatpush3.msra.mxu0 %v1531_v25 }
 0x829   :  { %2576 = vmatprep.subr.mxu0 %v1530_v26 }
 0x82a   :  { %2577 = vmatpush3.msra.mxu0 %v1530_v26 }
 0x8ae   :  { %v1496_v5 = vpop.xlane.xlu1 %1495 }
 0x8af   :  { %v1499_v17 = vmul.f32 0.03125, %v1496_v5 }
 0x8b0   :  { %v1493_v18 = vpop.xlane.xlu0 %1492 }
 0x8b1   :  { %v1501_v19 = vsub.f32 %v1488_v13, %v1499_v17  ;;  %v1498_v1 = vmul.f32 0.03125, %v1493_v18 }
 0x8b3   :  { %v1500_v20 = vsub.f32 %v1487_v15, %v1498_v1  ;;  %v1503_v21 = vmul.f32 %v1501_v19, %v1501_v19 }
 0x8b5   :  { %v1507_v22 = vsel %vm157_vm0, %v1503_v21, 0.0  ;;  %v1502_v23 = vmul.f32 %v1500_v20, %v1500_v20  ;;  %v2181_v21 = vld [vmem:[#allocation2 + $0x352] ss:$0 sm:$0xff] }
 0x8b6   :  { %1508 = vadd.xlane.f32.xlu1 %v1507_v22 }
 0x8b7   :  { %v1504_v28 = vsel %vm157_vm0, %v1502_v23, 0.0 }
 0x8b8   :  { %1505 = vadd.xlane.f32.xlu0 %v1504_v28 }
 0x93f   :  { %v1509_v29 = vpop.xlane.xlu1 %1508 }
 0x940   :  { %v1511_v30 = vmul.f32 0.03125, %v1509_v29 }
 0x941   :  { %v1506_v31 = vpop.xlane.xlu0 %1505 }
 0x942   :  { %v1513_v32 = vadd.f32 1e-05, %v1511_v30  ;;  %v1510_v33 = vmul.f32 0.03125, %v1506_v31 }
 0x944   :  { %2711 = vrsqrt.f32 %v1513_v32  ;;  %v1512_v34 = vadd.f32 1e-05, %v1510_v33 }
 0x946   :  { %2713 = vrsqrt.f32 %v1512_v34 }
 0x951   :  { %v2712_v35 = vpop.eup %2711 }
 0x952   :  { %v1517_v38 = vmul.f32 %v2712_v35, %v1501_v19 }
 0x953   :  { %v2714_v39 = vpop.eup %2713 }
 0x954   :  { %v1516_v40 = vmul.f32 %v2714_v39, %v1500_v20  ;;  %v1523_v41 = vmul.f32 %v2176_v37, %v1517_v38 }
 0x956   :  { %v1522_v43 = vmul.f32 %v2176_v37, %v1516_v40  ;;  %v2946_v46 = vadd.f32 %v2177_v42, %v1523_v41  ;;  %v1779_v41 = vld [vmem:[#allocation2 + $0x278] sm:$0xff] }
 0x957   :  { %2616 = vmatprep.subr.mxu0 %v1779_v41 }
 0x958   :  { %v2944_v45 = vadd.f32 %v2177_v42, %v1522_v43  ;;  %v1778_v42 = vld [vmem:[#allocation2 + $0x270] sm:$0xff]  ;;  %v1777_v43 = vld [vmem:[#allocation2 + $0x268] sm:$0xff] }
 0x95a   :  { %2578 = vmatprep.mubr.msk.f32.mxu0 %vm157_vm0, %v2944_v45 }
 0x95b   :  { %2579 = vmatmul.mubr.msk.f32.vlgmr.msra.gmra.mxu0 %vm157_vm0, %v2946_v46 }
 0x95c   :  { %2617 = vmatpush3.msra.mxu0 %v1779_v41  ;;  %v2061_v41 = vld [vmem:[#allocation2 + $0x340] sm:$0xff] }
 0x95d   :  { %2618 = vmatprep.subr.mxu0 %v1778_v42 }
 0x95e   :  { %2619 = vmatpush3.msra.mxu0 %v1778_v42 }
 0x95f   :  { %2620 = vmatprep.subr.mxu0 %v1777_v43 }
 0x960   :  { %2621 = vmatpush3.msra.mxu0 %v1777_v43 }
 0xa1b   :  { %v2580_v0 = vpop.f32.mrf.mxu0 }
 0xa1c   :  { %v1617_v2 = vadd.f32 %v2580_v0, %v2178_v63  ;;  %v1881_v0 = vld [vmem:[#allocation2 + $0x2e8] sm:$0xff] }
 0xa1d   :  { %v1611_v3 = vpop.f32.mrf.mxu0 }
 0xa1e   :  { %v1623_v4 = vmul.f32 0.044715, %v1617_v2  ;;  %v1612_v6 = vadd.f32 %v2178_v63, %v1611_v3  ;;  %v1621_v19 = vmul.f32 0.5, %v1617_v2  ;;  %v1882_v63 = vld [vmem:[#allocation2 + $0x2f0] sm:$0xff]  ;;  %v1879_v3 = vld [vmem:[#allocation2 + $0x2d8] sm:$0xff] }
 0xa20   :  { %v1625_v7 = vmul.f32 %v1623_v4, %v1617_v2  ;;  %v1622_v8 = vmul.f32 0.044715, %v1612_v6  ;;  %v1620_v17 = vmul.f32 0.5, %v1612_v6  ;;  %v1878_v4 = vld [vmem:[#allocation2 + $0x2d0] sm:$0xff] }
 0xa22   :  { %v1627_v9 = vmul.f32 %v1625_v7, %v1617_v2  ;;  %v1624_v10 = vmul.f32 %v1622_v8, %v1612_v6  ;;  %v1876_v7 = vld [vmem:[#allocation2 + $0x2c0] sm:$0xff]  ;;  %v1875_v8 = vld [vmem:[#allocation2 + $0x2b8] sm:$0xff] }
 0xa24   :  { %v1629_v11 = vadd.f32 %v1627_v9, %v1617_v2  ;;  %v1626_v44 = vmul.f32 %v1624_v10, %v1612_v6  ;;  %v1880_v2 = vld [vmem:[#allocation2 + $0x2e0] sm:$0xff]  ;;  %v1874_v9 = vld [vmem:[#allocation2 + $0x2b0] sm:$0xff]  ;;  %v1873_v10 = vld [vmem:[#allocation2 + $0x2a8] sm:$0xff] }
 0xa26   :  { %v1628_v12 = vadd.f32 %v1626_v44, %v1612_v6  ;;  %v1631_v13 = vmul.f32 0.7978846, %v1629_v11  ;;  %v1877_v6 = vld [vmem:[#allocation2 + $0x2c8] sm:$0xff]  ;;  %v1872_v11 = vld [vmem:[#allocation2 + $0x2a0] sm:$0xff]  ;;  %v1871_v44 = vld [vmem:[#allocation2 + $0x298] sm:$0xff] }
 0xa28   :  { %v1630_v14 = vmul.f32 0.7978846, %v1628_v12  ;;  %2715 = vtanh.f32 %v1631_v13  ;;  %v1870_v12 = vld [vmem:[#allocation2 + $0x290] sm:$0xff]  ;;  %v1869_v13 = vld [vmem:[#allocation2 + $0x288] sm:$0xff] }
 0xa2a   :  { %2717 = vtanh.f32 %v1630_v14  ;;  %v1868_v14 = vld [vmem:[#allocation2 + $0x280] sm:$0xff] }
 0xa35   :  { %v2716_v15 = vpop.eup %2715 }
 0xa36   :  { %v1635_v5 = vadd.f32 1.0, %v2716_v15  ;;  %v1973_v15 = vld [vmem:[#allocation2 + $0x338] sm:$0xff] }
 0xa37   :  { %v2718_v16 = vpop.eup %2717  ;;  %2662 = vmatprep.subr.mxu1 %v1973_v15 }
 0xa38   :  { %v1634_v18 = vadd.f32 1.0, %v2718_v16  ;;  %v1637_v20 = vmul.f32 %v1635_v5, %v1621_v19  ;;  %v1972_v16 = vld [vmem:[#allocation2 + $0x330] sm:$0xff]  ;;  %v1971_v5 = vld [vmem:[#allocation2 + $0x328] sm:$0xff] }
 0xa3a   :  { %v1636_v1 = vmul.f32 %v1634_v18, %v1620_v17  ;;  %v1970_v17 = vld [vmem:[#allocation2 + $0x320] sm:$0xff]  ;;  %v2184_v18 = vld [vmem:[#allocation2 + $0x355] ss:$0 sm:$0xff] }
 0xa3c   :  { %2613 = vmatprep.mubr.f32.mxu1 %v1636_v1 }
 0xa3d   :  { %2614 = vmatmul.mubr.f32.vlgmr.msra.gmra.mxu1 %v1637_v20 }
 0xa3e   :  { %2663 = vmatpush3.msra.mxu1 %v1973_v15 }
 0xa3f   :  { %2664 = vmatprep.subr.mxu1 %v1972_v16 }
 0xa40   :  { %2665 = vmatpush3.msra.mxu1 %v1972_v16 }
 0xa41   :  { %2666 = vmatprep.subr.mxu1 %v1971_v5 }
 0xa42   :  { %2667 = vmatpush3.msra.mxu1 %v1971_v5 }
 0xa43   :  { %2668 = vmatprep.subr.mxu1 %v1970_v17 }
 0xa44   :  { %2669 = vmatpush3.msra.mxu1 %v1970_v17 }
 0xafd   :  { %v2615_v22 = vpop.f32.mrf.mxu1 }
 0xafe   :  { %v1731_v23 = vadd.f32 %v2615_v22, %v2181_v21 }
 0xaff   :  { %v1725_v28 = vpop.f32.mrf.mxu1 }
 0xb00   :  { %v1726_v24 = vadd.f32 %v2181_v21, %v1725_v28  ;;  %v1735_v27 = vadd.f32 %v1731_v23, %v2946_v46  ;;  %v1883_v46 = vld [vmem:[#allocation2 + $0x2f8] sm:$0xff] }
 0xb01   :  { %v1969_v28 = vld [vmem:[#allocation2 + $0x318] sm:$0xff] }
 0xb02   :  { %v1741_v25 = vsel %vm157_vm0, %v1735_v27, 0.0  ;;  %v1734_v26 = vadd.f32 %v1726_v24, %v2944_v45  ;;  %v1776_v45 = vld [vmem:[#allocation2 + $0x260] sm:$0xff]  ;;  %2670 = vmatprep.subr.mxu1 %v1969_v28  ;;  %v1968_v24 = vld [vmem:[#allocation2 + $0x310] sm:$0xff] }
 0xb03   :  { %1742 = vadd.xlane.f32.xlu1 %v1741_v25  ;;  %2622 = vmatprep.subr.mxu0 %v1776_v45  ;;  %v1966_v25 = vld [vmem:[#allocation2 + $0x300] sm:$0xff] }
 0xb04   :  { %v1738_v29 = vsel %vm157_vm0, %v1734_v26, 0.0  ;;  %2623 = vmatpush3.msra.mxu0 %v1776_v45  ;;  %2671 = vmatpush3.msra.mxu1 %v1969_v28 }
 0xb05   :  { %1739 = vadd.xlane.f32.xlu0 %v1738_v29  ;;  %2627 = vmatprep.subr.mxu0 %v1883_v46 }
 0xb06   :  { %2672 = vmatprep.subr.mxu1 %v1968_v24 }
 0xb07   :  { %2673 = vmatpush3.msra.mxu1 %v1968_v24 }
 0xb8c   :  { %v1743_v30 = vpop.xlane.xlu1 %1742 }
 0xb8d   :  { %v1745_v31 = vmul.f32 0.03125, %v1743_v30 }
 0xb8e   :  { %v1740_v32 = vpop.xlane.xlu0 %1739 }
 0xb8f   :  { %v1747_v33 = vsub.f32 %v1735_v27, %v1745_v31  ;;  %v1744_v34 = vmul.f32 0.03125, %v1740_v32  ;;  %v1967_v27 = vld [vmem:[#allocation2 + $0x308] sm:$0xff] }
 0xb90   :  { %2674 = vmatprep.subr.mxu1 %v1967_v27 }
 0xb91   :  { %v1746_v35 = vsub.f32 %v1734_v26, %v1744_v34  ;;  %v1749_v37 = vmul.f32 %v1747_v33, %v1747_v33  ;;  %2675 = vmatpush3.msra.mxu1 %v1967_v27  ;;  %v2187_v26 = vld [vmem:[#allocation2 + $0x356] ss:$0 sm:$0xff] }
 0xb92   :  { %2676 = vmatprep.subr.mxu1 %v1966_v25 }
 0xb93   :  { %v1753_v38 = vsel %vm157_vm0, %v1749_v37, 0.0  ;;  %v1748_v39 = vmul.f32 %v1746_v35, %v1746_v35  ;;  %2677 = vmatpush3.msra.mxu1 %v1966_v25 }
 0xb94   :  { %1754 = vadd.xlane.f32.xlu1 %v1753_v38 }
 0xb95   :  { %v1750_v40 = vsel %vm157_vm0, %v1748_v39, 0.0 }
 0xb96   :  { %1751 = vadd.xlane.f32.xlu0 %v1750_v40 }
 0xc1d   :  { %v1755_v47 = vpop.xlane.xlu1 %1754 }
 0xc1e   :  { %v1757_v48 = vmul.f32 0.03125, %v1755_v47 }
 0xc1f   :  { %v1752_v49 = vpop.xlane.xlu0 %1751 }
 0xc20   :  { %v1759_v50 = vadd.f32 1e-05, %v1757_v48  ;;  %v1756_v51 = vmul.f32 0.03125, %v1752_v49 }
 0xc22   :  { %2719 = vrsqrt.f32 %v1759_v50  ;;  %v1758_v52 = vadd.f32 1e-05, %v1756_v51 }
 0xc24   :  { %2721 = vrsqrt.f32 %v1758_v52 }
 0xc2f   :  { %v2720_v53 = vpop.eup %2719 }
 0xc30   :  { %v1763_v55 = vmul.f32 %v2720_v53, %v1747_v33 }
 0xc31   :  { %v2722_v56 = vpop.eup %2721 }
 0xc32   :  { %v1762_v57 = vmul.f32 %v2722_v56, %v1746_v35  ;;  %v1769_v58 = vmul.f32 %v2182_v54, %v1763_v55  ;;  %v2188_v35 = vld [vmem:[#allocation2 + $0x357] ss:$0 sm:$0xff] }
 0xc34   :  { %v1768_v60 = vmul.f32 %v2182_v54, %v1762_v57  ;;  %v1775_v62 = vadd.f32 %v2183_v59, %v1769_v58 }
 0xc36   :  { %v1774_v61 = vadd.f32 %v2183_v59, %v1768_v60 }
 0xc38   :  { %2624 = vmatprep.mubr.msk.f32.mxu0 %vm157_vm0, %v1774_v61 }
 0xc39   :  { %2625 = vmatmul.mubr.msk.f32.vlgmr.msra.gmra.mxu0 %vm157_vm0, %v1775_v62 }
 0xc3a   :  { %2628 = vmatpush3.msra.mxu0 %v1883_v46 }
 0xc3b   :  { %2629 = vmatprep.subr.mxu0 %v1882_v63 }
 0xc3c   :  { %2630 = vmatpush3.msra.mxu0 %v1882_v63 }
 0xc3d   :  { %2631 = vmatprep.subr.mxu0 %v1881_v0 }
 0xc3e   :  { %2632 = vmatpush3.msra.mxu0 %v1881_v0 }
 0xc3f   :  { %2633 = vmatprep.subr.mxu0 %v1880_v2 }
 0xc40   :  { %2634 = vmatpush3.msra.mxu0 %v1880_v2 }
 0xc41   :  { %2635 = vmatprep.subr.mxu0 %v1879_v3 }
 0xc42   :  { %2636 = vmatpush3.msra.mxu0 %v1879_v3 }
 0xc43   :  { %2637 = vmatprep.subr.mxu0 %v1878_v4 }
 0xc44   :  { %2638 = vmatpush3.msra.mxu0 %v1878_v4 }
 0xc45   :  { %2639 = vmatprep.subr.mxu0 %v1877_v6 }
 0xc46   :  { %2640 = vmatpush3.msra.mxu0 %v1877_v6 }
 0xc47   :  { %2641 = vmatprep.subr.mxu0 %v1876_v7 }
 0xc48   :  { %2642 = vmatpush3.msra.mxu0 %v1876_v7 }
 0xc49   :  { %2643 = vmatprep.subr.mxu0 %v1875_v8 }
 0xc4a   :  { %2644 = vmatpush3.msra.mxu0 %v1875_v8 }
 0xc4b   :  { %2645 = vmatprep.subr.mxu0 %v1874_v9 }
 0xc4c   :  { %2646 = vmatpush3.msra.mxu0 %v1874_v9 }
 0xc4d   :  { %2647 = vmatprep.subr.mxu0 %v1873_v10 }
 0xc4e   :  { %2648 = vmatpush3.msra.mxu0 %v1873_v10 }
 0xc4f   :  { %2649 = vmatprep.subr.mxu0 %v1872_v11 }
 0xc50   :  { %2650 = vmatpush3.msra.mxu0 %v1872_v11 }
 0xc51   :  { %2651 = vmatprep.subr.mxu0 %v1871_v44 }
 0xc52   :  { %2652 = vmatpush3.msra.mxu0 %v1871_v44 }
 0xc53   :  { %2653 = vmatprep.subr.mxu0 %v1870_v12 }
 0xc54   :  { %2654 = vmatpush3.msra.mxu0 %v1870_v12 }
 0xc55   :  { %2655 = vmatprep.subr.mxu0 %v1869_v13 }
 0xc56   :  { %2656 = vmatpush3.msra.mxu0 %v1869_v13 }
 0xc57   :  { %2657 = vmatprep.subr.mxu0 %v1868_v14 }
 0xc58   :  { %2658 = vmatpush3.msra.mxu0 %v1868_v14 }
 0xc59   :  { %2681 = vmatprep.subr.mxu0 %v2770_v36 }
 0xcf9   :  { %v2626_v19 = vpop.f32.mrf.mxu0 }
 0xcfa   :  { %v1863_v1 = vadd.f32 %v2626_v19, %v2184_v18 }
 0xcfb   :  { %v1857_v20 = vpop.f32.mrf.mxu0 }
 0xcfc   :  { %v1858_v21 = vadd.f32 %v2184_v18, %v1857_v20  ;;  %v1867_v23 = vmax.f32 %v1863_v1, 0.0 }
 0xcfe   :  { %v1866_v22 = vmax.f32 %v1858_v21, 0.0 }
 0xd00   :  { %2659 = vmatprep.mubr.f32.mxu0 %v1866_v22 }
 0xd01   :  { %2660 = vmatmul.mubr.f32.vlgmr.msra.gmra.mxu0 %v1867_v23 }
 0xd02   :  { %2685 = vmatprep.mubr.msk.f32.mxu0 %vm2771_vm1, %v2770_v36 }
 0xdc1   :  { %v2661_v29 = vpop.f32.mrf.mxu0 }
 0xdc2   :  { %v1961_v30 = vadd.f32 %v2661_v29, %v2187_v26 }
 0xdc3   :  { %v1955_v31 = vpop.f32.mrf.mxu0 }
 0xdc4   :  { %v1956_v32 = vadd.f32 %v2187_v26, %v1955_v31  ;;  %v1965_v34 = vmax.f32 %v1961_v30, 0.0 }
 0xdc6   :  { %v1964_v33 = vmax.f32 %v1956_v32, 0.0 }
 0xdc8   :  { %2678 = vmatprep.mubr.msk.f32.mxu1 %vm1979_vm3, %v1964_v33 }
 0xdc9   :  { %2679 = vmatmul.mubr.msk.f32.vlgmr.msra.gmra.mxu1 %vm1979_vm3, %v1965_v34 }
 0xe89   :  { %v2680_v37 = vpop.f32.mrf.mxu1 }
 0xe8a   :  { %v2058_v38 = vadd.f32 %v2680_v37, %v2188_v35 }
 0xe8b   :  { %v2052_v39 = vpop.f32.mrf.mxu1 }
 0xe8c   :  { %v2053_v40 = vadd.f32 %v2188_v35, %v2052_v39  ;;  %2682 = vmatpush3.msra.mxu0 %v2058_v38 }
 0xe8d   :  { %2683 = vmatprep.subr.mxu0 %v2770_v36 }
 0xe8e   :  { %2684 = vmatpush3.msra.mxu0 %v2053_v40 }
 0xe8f   :  { %2686 = vmatmul.mubr.msk.f32.vlgmr.msra.gmra.mxu0 %vm2062_vm4, %v2061_v41 }
 0xf4f   :  { %v2132_v42 = vpop.f32.mrf.mxu0 }
 0xf50   :  { %2136 = vst [vmem:[#allocation5] sm:$0xff] %v2132_v42 }
 0xf51   :  { %v2687_v43 = vpop.f32.mrf.mxu0 }
 0xf52   :  { %2754 = shalt.err (!%p2751_p9)
}
 0xf53   :  { %2146 = dma.vmem_to_hbm [thread:$0]  %s2144_s4, 128, %s2970_s3, [#allocation4]  }
 0xf54   :  { %2765 = dma.done.wait [#allocation4], 128  }
 0xf55   :  { %2766 = vsyncadd [#allocation4], 4294967168 }
 0xf56   :  { %2150 = vsyncpa [#allocation3], 1 }
 0xf57   :  { %2151 = vsyncpa [#allocation4], 1 }

</bundles_post_ra>
